<compile_context>
chip_gen: v7x
topology: tpu7x:2x2x1
jax: 0.10.0
libtpu: 0.0.40
codegen_flags: <defaults>
</compile_context>

<pallas_src>
import functools

import jax
import jax.numpy as jnp
from jax import lax
from jax.experimental import pallas as pl
from jax.experimental.pallas import tpu as pltpu


def _round_up(x, m):
    return (x + m - 1) // m * m


def _largest_divisor_leq(n, cap, multiple=1):
    """Largest d <= cap with n % d == 0 and d % multiple == 0; falls back to n."""
    for d in range(min(cap, n), 0, -1):
        if n % d == 0 and d % multiple == 0:
            return d
    return n


_VMEM_LIMIT = 48 * 1024 * 1024    # scoped-VMEM ceiling; actual use stays far below


# ----------------------------------------------------------------------------
# Kernel 1: generic  out = x @ w + b  (hoisted input projection), K-tiled with
# an f32 VMEM accumulator (pl.when init / finalize).
# ----------------------------------------------------------------------------
def _matmul_bias_kernel(x_ref, w_ref, b_ref, o_ref, acc_ref):
    @pl.when(pl.program_id(2) == 0)
    def _init():
        acc_ref[...] = jnp.zeros_like(acc_ref)

    acc_ref[...] += jnp.dot(x_ref[...], w_ref[...],
                            preferred_element_type=jnp.float32)

    @pl.when(pl.program_id(2) == pl.num_programs(2) - 1)
    def _finalize():
        o_ref[...] = (acc_ref[...] + b_ref[...]).astype(o_ref.dtype)


def _matmul_bias(x, w, b2, *, out_dtype=jnp.float32, tm_cap=256, tn_cap=512):
    """x: (M, K) bf16, w: (K, N) bf16, b2: (1, N) f32 -> (M, N) out_dtype.
    Callers guarantee M % 8 == 0 and N % 128 == 0, so no output re-slicing."""
    M, K = x.shape
    N = w.shape[1]
    tm = _largest_divisor_leq(M, tm_cap, multiple=8)
    tn = _largest_divisor_leq(N, tn_cap, multiple=128)
    # K tiling keeps double-buffered blocks inside v5e's small scoped VMEM for
    # large K; otherwise a full-extent K block is allowed and cheapest.
    if K > 512 and K % 512 == 0:
        tk = 512
    elif K > 1024 and K % 256 == 0:
        tk = 256
    else:
        tk = K

    return pl.pallas_call(
        _matmul_bias_kernel,
        out_shape=jax.ShapeDtypeStruct((M, N), out_dtype),
        grid_spec=pltpu.PrefetchScalarGridSpec(
            num_scalar_prefetch=0,
            grid=(M // tm, N // tn, K // tk),
            in_specs=[
                pl.BlockSpec((tm, tk), lambda i, j, k: (i, k)),
                pl.BlockSpec((tk, tn), lambda i, j, k: (k, j)),
                pl.BlockSpec((1, tn), lambda i, j, k: (0, j)),
            ],
            out_specs=pl.BlockSpec((tm, tn), lambda i, j, k: (i, j)),
            scratch_shapes=[pltpu.VMEM((tm, tn), jnp.float32)],
        ),
        compiler_params=pltpu.CompilerParams(
            dimension_semantics=("parallel", "parallel", "arbitrary"),
            vmem_limit_bytes=_VMEM_LIMIT),
    )(x, w, b2)


# ----------------------------------------------------------------------------
# Kernel 2: LSTM recurrence, T-chunked and batch-blocked.
# ----------------------------------------------------------------------------
def _lstm_recurrence_kernel(gates_ref, whh_ref, hs_ref, hn_ref, cn_ref,
                            h_scr, c_scr):
    """One T-chunk for one batch block.

    gates_ref: (TT, BB, 4*Hp) f32   x @ W_ih^T + (b_ih + b_hh), gate-major
               (i|f|g|o), each gate zero-padded to Hp lanes.
    whh_ref  : (Hp, 4*Hp)  bf16     W_hh^T, same gate-major padded layout.
    hs_ref   : (TT, BB, Hp) bf16    hidden states for the LM head.
    hn_ref / cn_ref: (BB, Hp) f32   final states (written once, last chunk).
    h_scr / c_scr  : (BB, Hp) f32   recurrent state carried across chunks.
    """
    t_chunk = pl.program_id(1)
    TT = gates_ref.shape[0]
    BB, Hp = hn_ref.shape

    @pl.when(t_chunk == 0)
    def _init():
        h_scr[...] = jnp.zeros_like(h_scr)
        c_scr[...] = jnp.zeros_like(c_scr)

    whh = whh_ref[...]            # loaded once per chunk, VMEM resident

    # State lives in VMEM scratch (not fori carries); unroll only while the
    # (BB, Hp) live values fit comfortably in the 64-vreg file.
    state_vregs = max(1, (BB * Hp) // (8 * 128))
    unroll = TT if (TT <= 8 and state_vregs <= 2) else (2 if state_vregs <= 16 else 1)

    def step(t, carry):
        h = h_scr[...]
        c = c_scr[...]
        # Single fused (BB, Hp) x (Hp, 4*Hp) MXU dot, f32 accumulation; the
        # gate pre-activations stay f32 for sigmoid/tanh (v5e has no bf16 EUP).
        pre = gates_ref[t] + jnp.dot(h.astype(jnp.bfloat16), whh,
                                     preferred_element_type=jnp.float32)
        i_g = jax.nn.sigmoid(pre[:, 0 * Hp:1 * Hp])
        f_g = jax.nn.sigmoid(pre[:, 1 * Hp:2 * Hp])
        g_g = jnp.tanh(pre[:, 2 * Hp:3 * Hp])
        o_g = jax.nn.sigmoid(pre[:, 3 * Hp:4 * Hp])
        c_new = f_g * c + i_g * g_g
        h_new = o_g * jnp.tanh(c_new)
        hs_ref[t] = h_new.astype(hs_ref.dtype)
        h_scr[...] = h_new
        c_scr[...] = c_new
        return carry

    lax.fori_loop(0, TT, step, 0, unroll=unroll)

    @pl.when(t_chunk == pl.num_programs(1) - 1)
    def _finalize():
        hn_ref[...] = h_scr[...]
        cn_ref[...] = c_scr[...]


# ----------------------------------------------------------------------------
# Kernel 3: LM head.  (TT2*BB, Hp) @ (Hp, tn) + b, with the time-major ->
# batch-major permutation folded into static per-t stores of the out block,
# so no XLA (T,B,V)->(B,T,V) transpose (and no logits HBM round-trip).
# ----------------------------------------------------------------------------
def _lm_head_kernel(hs_ref, w_ref, b_ref, o_ref):
    TT2, BB, Hp = hs_ref.shape
    h2 = hs_ref[...].reshape(TT2 * BB, Hp)
    y = jnp.dot(h2, w_ref[...], preferred_element_type=jnp.float32) + b_ref[...]
    y3 = y.reshape(TT2, BB, -1)
    for t in range(TT2):                           # static, small
        o_ref[:, t, :] = y3[t].astype(o_ref.dtype)


# ----------------------------------------------------------------------------
# One-time parameter preparation (padding / transposing / casting done ONCE,
# never per forward call).
# ----------------------------------------------------------------------------
def prepare_params(params):
    emb, w_ih, w_hh = params["emb"], params["w_ih"], params["w_hh"]
    b_ih, b_hh = params["b_ih"], params["b_hh"]
    w_lin, b_lin = params["w_lin"], params["b_lin"]

    V, _E = emb.shape
    H = w_hh.shape[1]
    Hp = _round_up(H, 128)           # lane-dense gate width
    Vp = _round_up(V, 128)           # lane-dense vocab width

    def gate_major_pad(w4h):          # (rows, 4H) -> (rows, 4Hp), per-gate zero pad
        rows = w4h.shape[0]
        out = jnp.zeros((rows, 4 * Hp), jnp.float32)
        for g in range(4):            # PyTorch gate order i, f, g, o
            out = out.at[:, g * Hp:g * Hp + H].set(w4h[:, g * H:(g + 1) * H])
        return out

    wi = gate_major_pad(w_ih.T.astype(jnp.float32))                        # (E, 4Hp)
    bg = gate_major_pad((b_ih + b_hh).astype(jnp.float32)[None, :])        # (1, 4Hp)
    whh = jnp.zeros((Hp, 4 * Hp), jnp.float32).at[:H].set(
        gate_major_pad(w_hh.T.astype(jnp.float32)))                        # (Hp, 4Hp)
    wl = jnp.zeros((Hp, Vp), jnp.float32).at[:H, :V].set(
        w_lin.T.astype(jnp.float32))                                       # (Hp, Vp)
    bl = jnp.zeros((1, Vp), jnp.float32).at[0, :V].set(
        b_lin.astype(jnp.float32))                                         # (1, Vp)

    return {
        "emb": emb.astype(jnp.bfloat16),
        "w_ih_t": wi.astype(jnp.bfloat16),
        "b_gates": bg,                    # f32
        "w_hh_t": whh.astype(jnp.bfloat16),
        "w_lin_t": wl.astype(jnp.bfloat16),
        "b_lin": bl,                      # f32
    }


# ----------------------------------------------------------------------------
# Forward pass.
# ----------------------------------------------------------------------------
# TODO(synk): explicit non-zero h0/c0 initial state not supported (PyTorch default
# h0=None -> zeros is implemented); would require feeding them into the first
# recurrence chunk's scratch init.
@functools.partial(jax.jit, static_argnames=("num_embeddings", "hidden_size"))
def sequence_generation_forward(x_ids, p, *, num_embeddings, hidden_size):
    """x_ids: int32 (B, T). Returns (logits (B, T, V), (h_n (1,B,H), c_n (1,B,H)))."""
    V, H = num_embeddings, hidden_size
    emb = p["emb"]          # (V, E)     bf16
    wi = p["w_ih_t"]        # (E, 4Hp)   bf16 gate-major padded
    bg = p["b_gates"]       # (1, 4Hp)   f32
    whh = p["w_hh_t"]       # (Hp, 4Hp)  bf16
    wl = p["w_lin_t"]       # (Hp, Vp)   bf16
    bl = p["b_lin"]         # (1, Vp)    f32

    B, T = x_ids.shape
    E = emb.shape[1]
    Hp, H4p = whh.shape
    Vp = wl.shape[1]

    # Batch blocking: >=2 blocks when possible so the 'parallel' axis can span
    # both v7x TensorCores; blocks are sublane-aligned (multiples of 8).
    B8 = _round_up(B, 8)
    BB = B8 if B8 <= 8 else min(_round_up(B8 // 2, 8), 128)
    B_pad = _round_up(B8, BB)
    nb = B_pad // BB

    # --- glue: time-major embedding gather (no (B,T,E)->(T,B,E) transpose) ----
    xe = jnp.take(emb, x_ids.T, axis=0)                        # (T, B, E) bf16
    if B_pad != B:
        xe = jnp.pad(xe, ((0, 0), (0, B_pad - B), (0, 0)))

    # --- (1) hoisted input projection: one (T*B_pad, E) x (E, 4Hp) GEMM -------
    gates = _matmul_bias(xe.reshape(T * B_pad, E), wi, bg,
                         out_dtype=jnp.float32)                 # f32 pre-acts
    gates = gates.reshape(T, B_pad, H4p)

    # --- (2) LSTM recurrence: grid = (batch blocks, T chunks) -----------------
    TT = _largest_divisor_leq(T, 32)
    nt = T // TT
    hs, h_n, c_n = pl.pallas_call(
        _lstm_recurrence_kernel,
        out_shape=(
            jax.ShapeDtypeStruct((T, B_pad, Hp), jnp.bfloat16),
            jax.ShapeDtypeStruct((B_pad, Hp), jnp.float32),
            jax.ShapeDtypeStruct((B_pad, Hp), jnp.float32),
        ),
        grid_spec=pltpu.PrefetchScalarGridSpec(
            num_scalar_prefetch=0,
            grid=(nb, nt),
            in_specs=[
                pl.BlockSpec((TT, BB, H4p), lambda b, t: (t, b, 0)),
                pl.BlockSpec((Hp, H4p), lambda b, t: (0, 0)),
            ],
            out_specs=(
                pl.BlockSpec((TT, BB, Hp), lambda b, t: (t, b, 0)),
                pl.BlockSpec((BB, Hp), lambda b, t: (b, 0)),
                pl.BlockSpec((BB, Hp), lambda b, t: (b, 0)),
            ),
            scratch_shapes=[pltpu.VMEM((BB, Hp), jnp.float32),
                            pltpu.VMEM((BB, Hp), jnp.float32)],
        ),
        compiler_params=pltpu.CompilerParams(
            dimension_semantics=("parallel", "arbitrary"),
            vmem_limit_bytes=_VMEM_LIMIT),
    )(gates, whh)

    # --- (3) LM head: (T*B, Hp) x (Hp, Vp); (T,B)->(B,T) folded into out_spec --
    TT2 = 8 if T % 8 == 0 else T      # out block 2nd-minor dim: mult of 8 or full T
    tn = _largest_divisor_leq(Vp, 512, multiple=128)
    logits = pl.pallas_call(
        _lm_head_kernel,
        out_shape=jax.ShapeDtypeStruct((B_pad, T, Vp), jnp.float32),
        grid_spec=pltpu.PrefetchScalarGridSpec(
            num_scalar_prefetch=0,
            grid=(nb, T // TT2, Vp // tn),
            in_specs=[
                pl.BlockSpec((TT2, BB, Hp), lambda b, t, j: (t, b, 0)),
                pl.BlockSpec((Hp, tn), lambda b, t, j: (0, j)),
                pl.BlockSpec((1, tn), lambda b, t, j: (0, j)),
            ],
            out_specs=pl.BlockSpec((BB, TT2, tn), lambda b, t, j: (b, t, j)),
        ),
        compiler_params=pltpu.CompilerParams(
            dimension_semantics=("parallel", "parallel", "parallel"),
            vmem_limit_bytes=_VMEM_LIMIT),
    )(hs, wl, bl)

    logits = logits[:B, :, :V]
    return logits, (h_n[None, :B, :H], c_n[None, :B, :H])


# ----------------------------------------------------------------------------
# Pure-JAX f32 reference (mirrors PyTorch LSTM math) for correctness check.
# ----------------------------------------------------------------------------
def reference_forward(x_ids, params):
    emb = params["emb"]
    w_ih, w_hh = params["w_ih"], params["w_hh"]
    b_ih, b_hh = params["b_ih"], params["b_hh"]
    w_lin, b_lin = params["w_lin"], params["b_lin"]

    xe = emb[x_ids]                                  # (B, T, E)
    B, T, _ = xe.shape
    H = w_hh.shape[1]
    h = jnp.zeros((B, H), jnp.float32)
    c = jnp.zeros((B, H), jnp.float32)
    outs = []
    for t in range(T):
        gates = xe[:, t] @ w_ih.T + b_ih + h @ w_hh.T + b_hh
        i = jax.nn.sigmoid(gates[:, 0 * H:1 * H])
        f = jax.nn.sigmoid(gates[:, 1 * H:2 * H])
        g = jnp.tanh(gates[:, 2 * H:3 * H])
        o = jax.nn.sigmoid(gates[:, 3 * H:4 * H])
        c = f * c + i * g
        h = o * jnp.tanh(c)
        outs.append(h)
    hs = jnp.stack(outs, axis=1)                     # (B, T, H)
    logits = hs @ w_lin.T + b_lin
    return logits, (h[None], c[None])


def init_params(key, num_embeddings, embedding_dim, hidden_size):
    ks = jax.random.split(key, 7)
    V, E, H = num_embeddings, embedding_dim, hidden_size
    s = 1.0 / jnp.sqrt(H)
    return {
        "emb":   jax.random.normal(ks[0], (V, E), jnp.float32),
        "w_ih":  jax.random.uniform(ks[1], (4 * H, E), jnp.float32, -s, s),
        "w_hh":  jax.random.uniform(ks[2], (4 * H, H), jnp.float32, -s, s),
        "b_ih":  jax.random.uniform(ks[3], (4 * H,), jnp.float32, -s, s),
        "b_hh":  jax.random.uniform(ks[4], (4 * H,), jnp.float32, -s, s),
        "w_lin": jax.random.uniform(ks[5], (V, H), jnp.float32, -s, s),
        "b_lin": jax.random.uniform(ks[6], (V,), jnp.float32, -s, s),
    }


if __name__ == "__main__":
    # Small shapes: batch=2, seq=8, vocab=128, embedding_dim=32, hidden=32.
    B, T = 2, 8
    NUM_EMBEDDINGS, EMB_DIM, HIDDEN = 128, 32, 32

    key = jax.random.PRNGKey(0)
    pkey, xkey = jax.random.split(key)
    params = init_params(pkey, NUM_EMBEDDINGS, EMB_DIM, HIDDEN)
    x_ids = jax.random.randint(xkey, (B, T), 0, NUM_EMBEDDINGS, dtype=jnp.int32)

    prepared = prepare_params(params)          # one-time pad/transpose/cast
    logits, (h_n, c_n) = sequence_generation_forward(
        x_ids, prepared, num_embeddings=NUM_EMBEDDINGS, hidden_size=HIDDEN)
    jax.block_until_ready((logits, h_n, c_n))

    ref_logits, (ref_h, ref_c) = reference_forward(x_ids, params)

    assert logits.shape == (B, T, NUM_EMBEDDINGS)
    assert h_n.shape == (1, B, HIDDEN) and c_n.shape == (1, B, HIDDEN)
    # Tolerance reflects bf16 MXU operands (per perf review) vs. the f32
    # reference; accumulation and gate math stay f32.
    assert jnp.allclose(logits, ref_logits, atol=5e-2, rtol=5e-2), (
        "max |err| = %f" % float(jnp.max(jnp.abs(logits - ref_logits))))
    assert jnp.allclose(h_n, ref_h, atol=5e-2, rtol=5e-2)
    assert jnp.allclose(c_n, ref_c, atol=5e-2, rtol=5e-2)

    print("KERNEL_OK")
</pallas_src>

<mosaic_0001>
module attributes {stable_mosaic.version = 11 : i64} {
  func.func @_matmul_bias_kernel(%arg0: i32, %arg1: i32, %arg2: i32, %arg3: memref<64x32xbf16, #tpu.memory_space<vmem>>, %arg4: memref<32x512xbf16, #tpu.memory_space<vmem>>, %arg5: memref<1x512xf32, #tpu.memory_space<vmem>>, %arg6: memref<64x512xf32, #tpu.memory_space<vmem>>, %arg7: memref<64x512xf32, #tpu.memory_space<vmem>>) attributes {dimension_semantics = [#tpu.dimension_semantics<parallel>, #tpu.dimension_semantics<parallel>, #tpu.dimension_semantics<arbitrary>], iteration_bounds = array<i64: 1, 1, 1>, scalar_prefetch = 0 : i64, scratch_operands = 1 : i64, tpu.core_type = #tpu.core_type<tc>, window_params = [{transform_indices = @transform_0, window_bounds = array<i64: 64, 32>}, {transform_indices = @transform_1, window_bounds = array<i64: 32, 512>}, {transform_indices = @transform_2, window_bounds = array<i64: 1, 512>}, {transform_indices = @transform_3, window_bounds = array<i64: 64, 512>}]} {
    %c0_i32 = arith.constant 0 : i32
    %0 = arith.cmpi eq, %arg2, %c0_i32 : i32
    %1 = arith.extui %0 : i1 to i32
    %c0_i32_0 = arith.constant 0 : i32
    %2 = arith.cmpi ne, %1, %c0_i32_0 : i32
    scf.if %2 {
      %cst_10 = arith.constant 0.000000e+00 : f32
      %12 = vector.broadcast %cst_10 : f32 to vector<64x512xf32>
      %c0_11 = arith.constant 0 : index
      %c0_12 = arith.constant 0 : index
      %13 = vector.load %arg7[%c0_11, %c0_12] : memref<64x512xf32, #tpu.memory_space<vmem>>, vector<64x512xf32>
      tpu.vector_store %arg7[%c0_11, %c0_12], %12 {strides = array<i32>} : memref<64x512xf32, #tpu.memory_space<vmem>>, vector<64x512xf32>,
    } else {
    }
    %c0 = arith.constant 0 : index
    %c0_1 = arith.constant 0 : index
    %3 = vector.load %arg7[%c0, %c0_1] : memref<64x512xf32, #tpu.memory_space<vmem>>, vector<64x512xf32>
    %c0_2 = arith.constant 0 : index
    %c0_3 = arith.constant 0 : index
    %4 = vector.load %arg3[%c0_2, %c0_3] : memref<64x32xbf16, #tpu.memory_space<vmem>>, vector<64x32xbf16>
    %c0_4 = arith.constant 0 : index
    %c0_5 = arith.constant 0 : index
    %5 = vector.load %arg4[%c0_4, %c0_5] : memref<32x512xbf16, #tpu.memory_space<vmem>>, vector<32x512xbf16>
    %cst = arith.constant dense<0.000000e+00> : vector<64x512xf32>
    %6 = tpu.matmul %4, %5, %cst {dimension_numbers = #tpu.dot_dimension_numbers<[1], [0], [0], [1], [0, 0, 1, 1], [], []>} : vector<64x32xbf16>, vector<32x512xbf16>, vector<64x512xf32> -> vector<64x512xf32>
    %7 = arith.addf %3, %6 : vector<64x512xf32>
    %c0_6 = arith.constant 0 : index
    %c0_7 = arith.constant 0 : index
    %8 = vector.load %arg7[%c0_6, %c0_7] : memref<64x512xf32, #tpu.memory_space<vmem>>, vector<64x512xf32>
    tpu.vector_store %arg7[%c0_6, %c0_7], %7 {strides = array<i32>} : memref<64x512xf32, #tpu.memory_space<vmem>>, vector<64x512xf32>,
    %c0_i32_8 = arith.constant 0 : i32
    %9 = arith.cmpi eq, %arg2, %c0_i32_8 : i32
    %10 = arith.extui %9 : i1 to i32
    %c0_i32_9 = arith.constant 0 : i32
    %11 = arith.cmpi ne, %10, %c0_i32_9 : i32
    scf.if %11 {
      %c0_10 = arith.constant 0 : index
      %c0_11 = arith.constant 0 : index
      %12 = vector.load %arg7[%c0_10, %c0_11] : memref<64x512xf32, #tpu.memory_space<vmem>>, vector<64x512xf32>
      %c0_12 = arith.constant 0 : index
      %c0_13 = arith.constant 0 : index
      %13 = vector.load %arg5[%c0_12, %c0_13] : memref<1x512xf32, #tpu.memory_space<vmem>>, vector<1x512xf32>
      %14 = vector.broadcast %13 : vector<1x512xf32> to vector<64x512xf32>
      %15 = arith.addf %12, %14 : vector<64x512xf32>
      %c0_14 = arith.constant 0 : index
      %c0_15 = arith.constant 0 : index
      %16 = vector.load %arg6[%c0_14, %c0_15] : memref<64x512xf32, #tpu.memory_space<vmem>>, vector<64x512xf32>
      tpu.vector_store %arg6[%c0_14, %c0_15], %15 {strides = array<i32>} : memref<64x512xf32, #tpu.memory_space<vmem>>, vector<64x512xf32>,
    } else {
    }
    return
  }
  func.func @transform_0(%arg0: i32, %arg1: i32, %arg2: i32) -> (i32, i32) {
    %c0_i32 = arith.constant 0 : i32
    return %arg0, %arg2 : i32, i32
  }
  func.func @transform_1(%arg0: i32, %arg1: i32, %arg2: i32) -> (i32, i32) {
    %c0_i32 = arith.constant 0 : i32
    return %arg2, %arg1 : i32, i32
  }
  func.func @transform_2(%arg0: i32, %arg1: i32, %arg2: i32) -> (i32, i32) {
    %c0_i32 = arith.constant 0 : i32
    %c0_i32_0 = arith.constant 0 : i32
    return %c0_i32, %arg1 : i32, i32
  }
  func.func @transform_3(%arg0: i32, %arg1: i32, %arg2: i32) -> (i32, i32) {
    %c0_i32 = arith.constant 0 : i32
    return %arg0, %arg1 : i32, i32
  }
}

module attributes {stable_mosaic.version = 11 : i64} {
  func.func @_lm_head_kernel(%arg0: i32, %arg1: i32, %arg2: i32, %arg3: memref<8x8x128xbf16, #tpu.memory_space<vmem>>, %arg4: memref<128x128xbf16, #tpu.memory_space<vmem>>, %arg5: memref<1x128xf32, #tpu.memory_space<vmem>>, %arg6: memref<8x8x128xf32, #tpu.memory_space<vmem>>) attributes {dimension_semantics = [#tpu.dimension_semantics<parallel>, #tpu.dimension_semantics<parallel>, #tpu.dimension_semantics<parallel>], iteration_bounds = array<i64: 1, 1, 1>, scalar_prefetch = 0 : i64, scratch_operands = 0 : i64, tpu.core_type = #tpu.core_type<tc>, window_params = [{transform_indices = @transform_0, window_bounds = array<i64: 8, 8, 128>}, {transform_indices = @transform_1, window_bounds = array<i64: 128, 128>}, {transform_indices = @transform_2, window_bounds = array<i64: 1, 128>}, {transform_indices = @transform_3, window_bounds = array<i64: 8, 8, 128>}]} {
    %c0 = arith.constant 0 : index
    %c0_0 = arith.constant 0 : index
    %c0_1 = arith.constant 0 : index
    %0 = vector.load %arg3[%c0, %c0_0, %c0_1] : memref<8x8x128xbf16, #tpu.memory_space<vmem>>, vector<8x8x128xbf16>
    %1 = vector.shape_cast %0 : vector<8x8x128xbf16> to vector<64x128xbf16>
    %c0_2 = arith.constant 0 : index
    %c0_3 = arith.constant 0 : index
    %2 = vector.load %arg4[%c0_2, %c0_3] : memref<128x128xbf16, #tpu.memory_space<vmem>>, vector<128x128xbf16>
    %cst = arith.constant dense<0.000000e+00> : vector<64x128xf32>
    %3 = tpu.matmul %1, %2, %cst {dimension_numbers = #tpu.dot_dimension_numbers<[1], [0], [0], [1], [0, 0, 1, 1], [], []>} : vector<64x128xbf16>, vector<128x128xbf16>, vector<64x128xf32> -> vector<64x128xf32>
    %c0_4 = arith.constant 0 : index
    %c0_5 = arith.constant 0 : index
    %4 = vector.load %arg5[%c0_4, %c0_5] : memref<1x128xf32, #tpu.memory_space<vmem>>, vector<1x128xf32>
    %5 = vector.broadcast %4 : vector<1x128xf32> to vector<64x128xf32>
    %6 = arith.addf %3, %5 : vector<64x128xf32>
    %7 = vector.shape_cast %6 : vector<64x128xf32> to vector<8x8x128xf32>
    %8 = vector.extract_strided_slice %7 {offsets = [0, 0, 0], sizes = [1, 8, 128], strides = [1, 1, 1]} : vector<8x8x128xf32> to vector<1x8x128xf32>
    %9 = vector.shape_cast %8 : vector<1x8x128xf32> to vector<8x128xf32>
    %c0_6 = arith.constant 0 : index
    %c0_7 = arith.constant 0 : index
    %c0_8 = arith.constant 0 : index
    %10 = vector.load %arg6[%c0_6, %c0_7, %c0_8] : memref<8x8x128xf32, #tpu.memory_space<vmem>>, vector<8x1x128xf32>
    %11 = vector.shape_cast %10 : vector<8x1x128xf32> to vector<8x128xf32>
    %12 = vector.shape_cast %9 : vector<8x128xf32> to vector<8x1x128xf32>
    tpu.vector_store %arg6[%c0_6, %c0_7, %c0_8], %12 {strides = array<i32>} : memref<8x8x128xf32, #tpu.memory_space<vmem>>, vector<8x1x128xf32>,
    %13 = vector.extract_strided_slice %7 {offsets = [1, 0, 0], sizes = [1, 8, 128], strides = [1, 1, 1]} : vector<8x8x128xf32> to vector<1x8x128xf32>
    %14 = vector.shape_cast %13 : vector<1x8x128xf32> to vector<8x128xf32>
    %c0_9 = arith.constant 0 : index
    %c1 = arith.constant 1 : index
    %c0_10 = arith.constant 0 : index
    %15 = vector.load %arg6[%c0_9, %c1, %c0_10] : memref<8x8x128xf32, #tpu.memory_space<vmem>>, vector<8x1x128xf32>
    %16 = vector.shape_cast %15 : vector<8x1x128xf32> to vector<8x128xf32>
    %17 = vector.shape_cast %14 : vector<8x128xf32> to vector<8x1x128xf32>
    tpu.vector_store %arg6[%c0_9, %c1, %c0_10], %17 {strides = array<i32>} : memref<8x8x128xf32, #tpu.memory_space<vmem>>, vector<8x1x128xf32>,
    %18 = vector.extract_strided_slice %7 {offsets = [2, 0, 0], sizes = [1, 8, 128], strides = [1, 1, 1]} : vector<8x8x128xf32> to vector<1x8x128xf32>
    %19 = vector.shape_cast %18 : vector<1x8x128xf32> to vector<8x128xf32>
    %c0_11 = arith.constant 0 : index
    %c2 = arith.constant 2 : index
    %c0_12 = arith.constant 0 : index
    %20 = vector.load %arg6[%c0_11, %c2, %c0_12] : memref<8x8x128xf32, #tpu.memory_space<vmem>>, vector<8x1x128xf32>
    %21 = vector.shape_cast %20 : vector<8x1x128xf32> to vector<8x128xf32>
    %22 = vector.shape_cast %19 : vector<8x128xf32> to vector<8x1x128xf32>
    tpu.vector_store %arg6[%c0_11, %c2, %c0_12], %22 {strides = array<i32>} : memref<8x8x128xf32, #tpu.memory_space<vmem>>, vector<8x1x128xf32>,
    %23 = vector.extract_strided_slice %7 {offsets = [3, 0, 0], sizes = [1, 8, 128], strides = [1, 1, 1]} : vector<8x8x128xf32> to vector<1x8x128xf32>
    %24 = vector.shape_cast %23 : vector<1x8x128xf32> to vector<8x128xf32>
    %c0_13 = arith.constant 0 : index
    %c3 = arith.constant 3 : index
    %c0_14 = arith.constant 0 : index
    %25 = vector.load %arg6[%c0_13, %c3, %c0_14] : memref<8x8x128xf32, #tpu.memory_space<vmem>>, vector<8x1x128xf32>
    %26 = vector.shape_cast %25 : vector<8x1x128xf32> to vector<8x128xf32>
    %27 = vector.shape_cast %24 : vector<8x128xf32> to vector<8x1x128xf32>
    tpu.vector_store %arg6[%c0_13, %c3, %c0_14], %27 {strides = array<i32>} : memref<8x8x128xf32, #tpu.memory_space<vmem>>, vector<8x1x128xf32>,
    %28 = vector.extract_strided_slice %7 {offsets = [4, 0, 0], sizes = [1, 8, 128], strides = [1, 1, 1]} : vector<8x8x128xf32> to vector<1x8x128xf32>
    %29 = vector.shape_cast %28 : vector<1x8x128xf32> to vector<8x128xf32>
    %c0_15 = arith.constant 0 : index
    %c4 = arith.constant 4 : index
    %c0_16 = arith.constant 0 : index
    %30 = vector.load %arg6[%c0_15, %c4, %c0_16] : memref<8x8x128xf32, #tpu.memory_space<vmem>>, vector<8x1x128xf32>
    %31 = vector.shape_cast %30 : vector<8x1x128xf32> to vector<8x128xf32>
    %32 = vector.shape_cast %29 : vector<8x128xf32> to vector<8x1x128xf32>
    tpu.vector_store %arg6[%c0_15, %c4, %c0_16], %32 {strides = array<i32>} : memref<8x8x128xf32, #tpu.memory_space<vmem>>, vector<8x1x128xf32>,
    %33 = vector.extract_strided_slice %7 {offsets = [5, 0, 0], sizes = [1, 8, 128], strides = [1, 1, 1]} : vector<8x8x128xf32> to vector<1x8x128xf32>
    %34 = vector.shape_cast %33 : vector<1x8x128xf32> to vector<8x128xf32>
    %c0_17 = arith.constant 0 : index
    %c5 = arith.constant 5 : index
    %c0_18 = arith.constant 0 : index
    %35 = vector.load %arg6[%c0_17, %c5, %c0_18] : memref<8x8x128xf32, #tpu.memory_space<vmem>>, vector<8x1x128xf32>
    %36 = vector.shape_cast %35 : vector<8x1x128xf32> to vector<8x128xf32>
    %37 = vector.shape_cast %34 : vector<8x128xf32> to vector<8x1x128xf32>
    tpu.vector_store %arg6[%c0_17, %c5, %c0_18], %37 {strides = array<i32>} : memref<8x8x128xf32, #tpu.memory_space<vmem>>, vector<8x1x128xf32>,
    %38 = vector.extract_strided_slice %7 {offsets = [6, 0, 0], sizes = [1, 8, 128], strides = [1, 1, 1]} : vector<8x8x128xf32> to vector<1x8x128xf32>
    %39 = vector.shape_cast %38 : vector<1x8x128xf32> to vector<8x128xf32>
    %c0_19 = arith.constant 0 : index
    %c6 = arith.constant 6 : index
    %c0_20 = arith.constant 0 : index
    %40 = vector.load %arg6[%c0_19, %c6, %c0_20] : memref<8x8x128xf32, #tpu.memory_space<vmem>>, vector<8x1x128xf32>
    %41 = vector.shape_cast %40 : vector<8x1x128xf32> to vector<8x128xf32>
    %42 = vector.shape_cast %39 : vector<8x128xf32> to vector<8x1x128xf32>
    tpu.vector_store %arg6[%c0_19, %c6, %c0_20], %42 {strides = array<i32>} : memref<8x8x128xf32, #tpu.memory_space<vmem>>, vector<8x1x128xf32>,
    %43 = vector.extract_strided_slice %7 {offsets = [7, 0, 0], sizes = [1, 8, 128], strides = [1, 1, 1]} : vector<8x8x128xf32> to vector<1x8x128xf32>
    %44 = vector.shape_cast %43 : vector<1x8x128xf32> to vector<8x128xf32>
    %c0_21 = arith.constant 0 : index
    %c7 = arith.constant 7 : index
    %c0_22 = arith.constant 0 : index
    %45 = vector.load %arg6[%c0_21, %c7, %c0_22] : memref<8x8x128xf32, #tpu.memory_space<vmem>>, vector<8x1x128xf32>
    %46 = vector.shape_cast %45 : vector<8x1x128xf32> to vector<8x128xf32>
    %47 = vector.shape_cast %44 : vector<8x128xf32> to vector<8x1x128xf32>
    tpu.vector_store %arg6[%c0_21, %c7, %c0_22], %47 {strides = array<i32>} : memref<8x8x128xf32, #tpu.memory_space<vmem>>, vector<8x1x128xf32>,
    return
  }
  func.func @transform_0(%arg0: i32, %arg1: i32, %arg2: i32) -> (i32, i32, i32) {
    %c0_i32 = arith.constant 0 : i32
    %c0_i32_0 = arith.constant 0 : i32
    return %arg1, %arg0, %c0_i32 : i32, i32, i32
  }
  func.func @transform_1(%arg0: i32, %arg1: i32, %arg2: i32) -> (i32, i32) {
    %c0_i32 = arith.constant 0 : i32
    %c0_i32_0 = arith.constant 0 : i32
    return %c0_i32, %arg2 : i32, i32
  }
  func.func @transform_2(%arg0: i32, %arg1: i32, %arg2: i32) -> (i32, i32) {
    %c0_i32 = arith.constant 0 : i32
    %c0_i32_0 = arith.constant 0 : i32
    return %c0_i32, %arg2 : i32, i32
  }
  func.func @transform_3(%arg0: i32, %arg1: i32, %arg2: i32) -> (i32, i32, i32) {
    %c0_i32 = arith.constant 0 : i32
    return %arg0, %arg1, %arg2 : i32, i32, i32
  }
}

module attributes {stable_mosaic.version = 11 : i64} {
  func.func @_lstm_recurrence_kernel(%arg0: i32, %arg1: i32, %arg2: memref<8x8x512xf32, #tpu.memory_space<vmem>>, %arg3: memref<128x512xbf16, #tpu.memory_space<vmem>>, %arg4: memref<8x8x128xbf16, #tpu.memory_space<vmem>>, %arg5: memref<8x128xf32, #tpu.memory_space<vmem>>, %arg6: memref<8x128xf32, #tpu.memory_space<vmem>>, %arg7: memref<8x128xf32, #tpu.memory_space<vmem>>, %arg8: memref<8x128xf32, #tpu.memory_space<vmem>>) attributes {dimension_semantics = [#tpu.dimension_semantics<parallel>, #tpu.dimension_semantics<arbitrary>], iteration_bounds = array<i64: 1, 1>, scalar_prefetch = 0 : i64, scratch_operands = 2 : i64, tpu.core_type = #tpu.core_type<tc>, window_params = [{transform_indices = @transform_0, window_bounds = array<i64: 8, 8, 512>}, {pipeline_mode = #tpu.pipeline_mode<synchronous>, transform_indices = @transform_1, window_bounds = array<i64: 128, 512>}, {transform_indices = @transform_2, window_bounds = array<i64: 8, 8, 128>}, {transform_indices = @transform_3, window_bounds = array<i64: 8, 128>}, {transform_indices = @transform_4, window_bounds = array<i64: 8, 128>}]} {
    %c0_i32 = arith.constant 0 : i32
    %0 = arith.cmpi eq, %arg1, %c0_i32 : i32
    %1 = arith.extui %0 : i1 to i32
    %c0_i32_0 = arith.constant 0 : i32
    %2 = arith.cmpi ne, %1, %c0_i32_0 : i32
    scf.if %2 {
      %cst_132 = arith.constant 0.000000e+00 : f32
      %327 = vector.broadcast %cst_132 : f32 to vector<8x128xf32>
      %c0_133 = arith.constant 0 : index
      %c0_134 = arith.constant 0 : index
      %328 = vector.load %arg7[%c0_133, %c0_134] : memref<8x128xf32, #tpu.memory_space<vmem>>, vector<8x128xf32>
      tpu.vector_store %arg7[%c0_133, %c0_134], %327 {strides = array<i32>} : memref<8x128xf32, #tpu.memory_space<vmem>>, vector<8x128xf32>,
      %cst_135 = arith.constant 0.000000e+00 : f32
      %329 = vector.broadcast %cst_135 : f32 to vector<8x128xf32>
      %c0_136 = arith.constant 0 : index
      %c0_137 = arith.constant 0 : index
      %330 = vector.load %arg8[%c0_136, %c0_137] : memref<8x128xf32, #tpu.memory_space<vmem>>, vector<8x128xf32>
      tpu.vector_store %arg8[%c0_136, %c0_137], %329 {strides = array<i32>} : memref<8x128xf32, #tpu.memory_space<vmem>>, vector<8x128xf32>,
    } else {
    }
    %c0 = arith.constant 0 : index
    %c0_1 = arith.constant 0 : index
    %3 = vector.load %arg3[%c0, %c0_1] : memref<128x512xbf16, #tpu.memory_space<vmem>>, vector<128x512xbf16>
    %c0_i32_2 = arith.constant 0 : i32
    %c0_3 = arith.constant 0 : index
    %c0_4 = arith.constant 0 : index
    %4 = vector.load %arg7[%c0_3, %c0_4] : memref<8x128xf32, #tpu.memory_space<vmem>>, vector<8x128xf32>
    %c0_5 = arith.constant 0 : index
    %c0_6 = arith.constant 0 : index
    %5 = vector.load %arg8[%c0_5, %c0_6] : memref<8x128xf32, #tpu.memory_space<vmem>>, vector<8x128xf32>
    %6 = arith.index_cast %c0_i32_2 : i32 to index
    %c0_7 = arith.constant 0 : index
    %c0_8 = arith.constant 0 : index
    %7 = vector.load %arg2[%6, %c0_7, %c0_8] : memref<8x8x512xf32, #tpu.memory_space<vmem>>, vector<1x8x512xf32>
    %8 = vector.shape_cast %7 : vector<1x8x512xf32> to vector<8x512xf32>
    %9 = arith.truncf %4 : vector<8x128xf32> to vector<8x128xbf16>
    %cst = arith.constant dense<0.000000e+00> : vector<8x512xf32>
    %10 = tpu.matmul %9, %3, %cst {dimension_numbers = #tpu.dot_dimension_numbers<[1], [0], [0], [1], [0, 0, 1, 1], [], []>} : vector<8x128xbf16>, vector<128x512xbf16>, vector<8x512xf32> -> vector<8x512xf32>
    %11 = arith.addf %8, %10 : vector<8x512xf32>
    %12 = vector.extract_strided_slice %11 {offsets = [0, 0], sizes = [8, 128], strides = [1, 1]} : vector<8x512xf32> to vector<8x128xf32>
    %13 = arith.negf %12 : vector<8x128xf32>
    %14 = math.exp %13 : vector<8x128xf32>
    %cst_9 = arith.constant 1.000000e+00 : f32
    %15 = vector.broadcast %cst_9 : f32 to vector<8x128xf32>
    %16 = arith.addf %15, %14 : vector<8x128xf32>
    %17 = arith.divf %15, %16 : vector<8x128xf32>
    %18 = vector.extract_strided_slice %11 {offsets = [0, 128], sizes = [8, 128], strides = [1, 1]} : vector<8x512xf32> to vector<8x128xf32>
    %19 = arith.negf %18 : vector<8x128xf32>
    %20 = math.exp %19 : vector<8x128xf32>
    %cst_10 = arith.constant 1.000000e+00 : f32
    %21 = vector.broadcast %cst_10 : f32 to vector<8x128xf32>
    %22 = arith.addf %21, %20 : vector<8x128xf32>
    %23 = arith.divf %21, %22 : vector<8x128xf32>
    %24 = vector.extract_strided_slice %11 {offsets = [0, 256], sizes = [8, 128], strides = [1, 1]} : vector<8x512xf32> to vector<8x128xf32>
    %25 = math.tanh %24 : vector<8x128xf32>
    %26 = vector.extract_strided_slice %11 {offsets = [0, 384], sizes = [8, 128], strides = [1, 1]} : vector<8x512xf32> to vector<8x128xf32>
    %27 = arith.negf %26 : vector<8x128xf32>
    %28 = math.exp %27 : vector<8x128xf32>
    %cst_11 = arith.constant 1.000000e+00 : f32
    %29 = vector.broadcast %cst_11 : f32 to vector<8x128xf32>
    %30 = arith.addf %29, %28 : vector<8x128xf32>
    %31 = arith.divf %29, %30 : vector<8x128xf32>
    %32 = arith.mulf %23, %5 : vector<8x128xf32>
    %33 = arith.mulf %17, %25 : vector<8x128xf32>
    %34 = arith.addf %32, %33 : vector<8x128xf32>
    %35 = math.tanh %34 : vector<8x128xf32>
    %36 = arith.mulf %31, %35 : vector<8x128xf32>
    %37 = arith.truncf %36 : vector<8x128xf32> to vector<8x128xbf16>
    %38 = arith.index_cast %c0_i32_2 : i32 to index
    %c0_12 = arith.constant 0 : index
    %c0_13 = arith.constant 0 : index
    %39 = vector.load %arg4[%38, %c0_12, %c0_13] : memref<8x8x128xbf16, #tpu.memory_space<vmem>>, vector<1x8x128xbf16>
    %40 = vector.shape_cast %39 : vector<1x8x128xbf16> to vector<8x128xbf16>
    %41 = vector.shape_cast %37 : vector<8x128xbf16> to vector<1x8x128xbf16>
    tpu.vector_store %arg4[%38, %c0_12, %c0_13], %41 {strides = array<i32>} : memref<8x8x128xbf16, #tpu.memory_space<vmem>>, vector<1x8x128xbf16>,
    %c0_14 = arith.constant 0 : index
    %c0_15 = arith.constant 0 : index
    %42 = vector.load %arg7[%c0_14, %c0_15] : memref<8x128xf32, #tpu.memory_space<vmem>>, vector<8x128xf32>
    tpu.vector_store %arg7[%c0_14, %c0_15], %36 {strides = array<i32>} : memref<8x128xf32, #tpu.memory_space<vmem>>, vector<8x128xf32>,
    %c0_16 = arith.constant 0 : index
    %c0_17 = arith.constant 0 : index
    %43 = vector.load %arg8[%c0_16, %c0_17] : memref<8x128xf32, #tpu.memory_space<vmem>>, vector<8x128xf32>
    tpu.vector_store %arg8[%c0_16, %c0_17], %34 {strides = array<i32>} : memref<8x128xf32, #tpu.memory_space<vmem>>, vector<8x128xf32>,
    %c1_i32 = arith.constant 1 : i32
    %c0_18 = arith.constant 0 : index
    %c0_19 = arith.constant 0 : index
    %44 = vector.load %arg7[%c0_18, %c0_19] : memref<8x128xf32, #tpu.memory_space<vmem>>, vector<8x128xf32>
    %c0_20 = arith.constant 0 : index
    %c0_21 = arith.constant 0 : index
    %45 = vector.load %arg8[%c0_20, %c0_21] : memref<8x128xf32, #tpu.memory_space<vmem>>, vector<8x128xf32>
    %46 = arith.index_cast %c1_i32 : i32 to index
    %c0_22 = arith.constant 0 : index
    %c0_23 = arith.constant 0 : index
    %47 = vector.load %arg2[%46, %c0_22, %c0_23] : memref<8x8x512xf32, #tpu.memory_space<vmem>>, vector<1x8x512xf32>
    %48 = vector.shape_cast %47 : vector<1x8x512xf32> to vector<8x512xf32>
    %49 = arith.truncf %44 : vector<8x128xf32> to vector<8x128xbf16>
    %cst_24 = arith.constant dense<0.000000e+00> : vector<8x512xf32>
    %50 = tpu.matmul %49, %3, %cst_24 {dimension_numbers = #tpu.dot_dimension_numbers<[1], [0], [0], [1], [0, 0, 1, 1], [], []>} : vector<8x128xbf16>, vector<128x512xbf16>, vector<8x512xf32> -> vector<8x512xf32>
    %51 = arith.addf %48, %50 : vector<8x512xf32>
    %52 = vector.extract_strided_slice %51 {offsets = [0, 0], sizes = [8, 128], strides = [1, 1]} : vector<8x512xf32> to vector<8x128xf32>
    %53 = arith.negf %52 : vector<8x128xf32>
    %54 = math.exp %53 : vector<8x128xf32>
    %cst_25 = arith.constant 1.000000e+00 : f32
    %55 = vector.broadcast %cst_25 : f32 to vector<8x128xf32>
    %56 = arith.addf %55, %54 : vector<8x128xf32>
    %57 = arith.divf %55, %56 : vector<8x128xf32>
    %58 = vector.extract_strided_slice %51 {offsets = [0, 128], sizes = [8, 128], strides = [1, 1]} : vector<8x512xf32> to vector<8x128xf32>
    %59 = arith.negf %58 : vector<8x128xf32>
    %60 = math.exp %59 : vector<8x128xf32>
    %cst_26 = arith.constant 1.000000e+00 : f32
    %61 = vector.broadcast %cst_26 : f32 to vector<8x128xf32>
    %62 = arith.addf %61, %60 : vector<8x128xf32>
    %63 = arith.divf %61, %62 : vector<8x128xf32>
    %64 = vector.extract_strided_slice %51 {offsets = [0, 256], sizes = [8, 128], strides = [1, 1]} : vector<8x512xf32> to vector<8x128xf32>
    %65 = math.tanh %64 : vector<8x128xf32>
    %66 = vector.extract_strided_slice %51 {offsets = [0, 384], sizes = [8, 128], strides = [1, 1]} : vector<8x512xf32> to vector<8x128xf32>
    %67 = arith.negf %66 : vector<8x128xf32>
    %68 = math.exp %67 : vector<8x128xf32>
    %cst_27 = arith.constant 1.000000e+00 : f32
    %69 = vector.broadcast %cst_27 : f32 to vector<8x128xf32>
    %70 = arith.addf %69, %68 : vector<8x128xf32>
    %71 = arith.divf %69, %70 : vector<8x128xf32>
    %72 = arith.mulf %63, %45 : vector<8x128xf32>
    %73 = arith.mulf %57, %65 : vector<8x128xf32>
    %74 = arith.addf %72, %73 : vector<8x128xf32>
    %75 = math.tanh %74 : vector<8x128xf32>
    %76 = arith.mulf %71, %75 : vector<8x128xf32>
    %77 = arith.truncf %76 : vector<8x128xf32> to vector<8x128xbf16>
    %78 = arith.index_cast %c1_i32 : i32 to index
    %c0_28 = arith.constant 0 : index
    %c0_29 = arith.constant 0 : index
    %79 = vector.load %arg4[%78, %c0_28, %c0_29] : memref<8x8x128xbf16, #tpu.memory_space<vmem>>, vector<1x8x128xbf16>
    %80 = vector.shape_cast %79 : vector<1x8x128xbf16> to vector<8x128xbf16>
    %81 = vector.shape_cast %77 : vector<8x128xbf16> to vector<1x8x128xbf16>
    tpu.vector_store %arg4[%78, %c0_28, %c0_29], %81 {strides = array<i32>} : memref<8x8x128xbf16, #tpu.memory_space<vmem>>, vector<1x8x128xbf16>,
    %c0_30 = arith.constant 0 : index
    %c0_31 = arith.constant 0 : index
    %82 = vector.load %arg7[%c0_30, %c0_31] : memref<8x128xf32, #tpu.memory_space<vmem>>, vector<8x128xf32>
    tpu.vector_store %arg7[%c0_30, %c0_31], %76 {strides = array<i32>} : memref<8x128xf32, #tpu.memory_space<vmem>>, vector<8x128xf32>,
    %c0_32 = arith.constant 0 : index
    %c0_33 = arith.constant 0 : index
    %83 = vector.load %arg8[%c0_32, %c0_33] : memref<8x128xf32, #tpu.memory_space<vmem>>, vector<8x128xf32>
    tpu.vector_store %arg8[%c0_32, %c0_33], %74 {strides = array<i32>} : memref<8x128xf32, #tpu.memory_space<vmem>>, vector<8x128xf32>,
    %c2_i32 = arith.constant 2 : i32
    %c0_34 = arith.constant 0 : index
    %c0_35 = arith.constant 0 : index
    %84 = vector.load %arg7[%c0_34, %c0_35] : memref<8x128xf32, #tpu.memory_space<vmem>>, vector<8x128xf32>
    %c0_36 = arith.constant 0 : index
    %c0_37 = arith.constant 0 : index
    %85 = vector.load %arg8[%c0_36, %c0_37] : memref<8x128xf32, #tpu.memory_space<vmem>>, vector<8x128xf32>
    %86 = arith.index_cast %c2_i32 : i32 to index
    %c0_38 = arith.constant 0 : index
    %c0_39 = arith.constant 0 : index
    %87 = vector.load %arg2[%86, %c0_38, %c0_39] : memref<8x8x512xf32, #tpu.memory_space<vmem>>, vector<1x8x512xf32>
    %88 = vector.shape_cast %87 : vector<1x8x512xf32> to vector<8x512xf32>
    %89 = arith.truncf %84 : vector<8x128xf32> to vector<8x128xbf16>
    %cst_40 = arith.constant dense<0.000000e+00> : vector<8x512xf32>
    %90 = tpu.matmul %89, %3, %cst_40 {dimension_numbers = #tpu.dot_dimension_numbers<[1], [0], [0], [1], [0, 0, 1, 1], [], []>} : vector<8x128xbf16>, vector<128x512xbf16>, vector<8x512xf32> -> vector<8x512xf32>
    %91 = arith.addf %88, %90 : vector<8x512xf32>
    %92 = vector.extract_strided_slice %91 {offsets = [0, 0], sizes = [8, 128], strides = [1, 1]} : vector<8x512xf32> to vector<8x128xf32>
    %93 = arith.negf %92 : vector<8x128xf32>
    %94 = math.exp %93 : vector<8x128xf32>
    %cst_41 = arith.constant 1.000000e+00 : f32
    %95 = vector.broadcast %cst_41 : f32 to vector<8x128xf32>
    %96 = arith.addf %95, %94 : vector<8x128xf32>
    %97 = arith.divf %95, %96 : vector<8x128xf32>
    %98 = vector.extract_strided_slice %91 {offsets = [0, 128], sizes = [8, 128], strides = [1, 1]} : vector<8x512xf32> to vector<8x128xf32>
    %99 = arith.negf %98 : vector<8x128xf32>
    %100 = math.exp %99 : vector<8x128xf32>
    %cst_42 = arith.constant 1.000000e+00 : f32
    %101 = vector.broadcast %cst_42 : f32 to vector<8x128xf32>
    %102 = arith.addf %101, %100 : vector<8x128xf32>
    %103 = arith.divf %101, %102 : vector<8x128xf32>
    %104 = vector.extract_strided_slice %91 {offsets = [0, 256], sizes = [8, 128], strides = [1, 1]} : vector<8x512xf32> to vector<8x128xf32>
    %105 = math.tanh %104 : vector<8x128xf32>
    %106 = vector.extract_strided_slice %91 {offsets = [0, 384], sizes = [8, 128], strides = [1, 1]} : vector<8x512xf32> to vector<8x128xf32>
    %107 = arith.negf %106 : vector<8x128xf32>
    %108 = math.exp %107 : vector<8x128xf32>
    %cst_43 = arith.constant 1.000000e+00 : f32
    %109 = vector.broadcast %cst_43 : f32 to vector<8x128xf32>
    %110 = arith.addf %109, %108 : vector<8x128xf32>
    %111 = arith.divf %109, %110 : vector<8x128xf32>
    %112 = arith.mulf %103, %85 : vector<8x128xf32>
    %113 = arith.mulf %97, %105 : vector<8x128xf32>
    %114 = arith.addf %112, %113 : vector<8x128xf32>
    %115 = math.tanh %114 : vector<8x128xf32>
    %116 = arith.mulf %111, %115 : vector<8x128xf32>
    %117 = arith.truncf %116 : vector<8x128xf32> to vector<8x128xbf16>
    %118 = arith.index_cast %c2_i32 : i32 to index
    %c0_44 = arith.constant 0 : index
    %c0_45 = arith.constant 0 : index
    %119 = vector.load %arg4[%118, %c0_44, %c0_45] : memref<8x8x128xbf16, #tpu.memory_space<vmem>>, vector<1x8x128xbf16>
    %120 = vector.shape_cast %119 : vector<1x8x128xbf16> to vector<8x128xbf16>
    %121 = vector.shape_cast %117 : vector<8x128xbf16> to vector<1x8x128xbf16>
    tpu.vector_store %arg4[%118, %c0_44, %c0_45], %121 {strides = array<i32>} : memref<8x8x128xbf16, #tpu.memory_space<vmem>>, vector<1x8x128xbf16>,
    %c0_46 = arith.constant 0 : index
    %c0_47 = arith.constant 0 : index
    %122 = vector.load %arg7[%c0_46, %c0_47] : memref<8x128xf32, #tpu.memory_space<vmem>>, vector<8x128xf32>
    tpu.vector_store %arg7[%c0_46, %c0_47], %116 {strides = array<i32>} : memref<8x128xf32, #tpu.memory_space<vmem>>, vector<8x128xf32>,
    %c0_48 = arith.constant 0 : index
    %c0_49 = arith.constant 0 : index
    %123 = vector.load %arg8[%c0_48, %c0_49] : memref<8x128xf32, #tpu.memory_space<vmem>>, vector<8x128xf32>
    tpu.vector_store %arg8[%c0_48, %c0_49], %114 {strides = array<i32>} : memref<8x128xf32, #tpu.memory_space<vmem>>, vector<8x128xf32>,
    %c3_i32 = arith.constant 3 : i32
    %c0_50 = arith.constant 0 : index
    %c0_51 = arith.constant 0 : index
    %124 = vector.load %arg7[%c0_50, %c0_51] : memref<8x128xf32, #tpu.memory_space<vmem>>, vector<8x128xf32>
    %c0_52 = arith.constant 0 : index
    %c0_53 = arith.constant 0 : index
    %125 = vector.load %arg8[%c0_52, %c0_53] : memref<8x128xf32, #tpu.memory_space<vmem>>, vector<8x128xf32>
    %126 = arith.index_cast %c3_i32 : i32 to index
    %c0_54 = arith.constant 0 : index
    %c0_55 = arith.constant 0 : index
    %127 = vector.load %arg2[%126, %c0_54, %c0_55] : memref<8x8x512xf32, #tpu.memory_space<vmem>>, vector<1x8x512xf32>
    %128 = vector.shape_cast %127 : vector<1x8x512xf32> to vector<8x512xf32>
    %129 = arith.truncf %124 : vector<8x128xf32> to vector<8x128xbf16>
    %cst_56 = arith.constant dense<0.000000e+00> : vector<8x512xf32>
    %130 = tpu.matmul %129, %3, %cst_56 {dimension_numbers = #tpu.dot_dimension_numbers<[1], [0], [0], [1], [0, 0, 1, 1], [], []>} : vector<8x128xbf16>, vector<128x512xbf16>, vector<8x512xf32> -> vector<8x512xf32>
    %131 = arith.addf %128, %130 : vector<8x512xf32>
    %132 = vector.extract_strided_slice %131 {offsets = [0, 0], sizes = [8, 128], strides = [1, 1]} : vector<8x512xf32> to vector<8x128xf32>
    %133 = arith.negf %132 : vector<8x128xf32>
    %134 = math.exp %133 : vector<8x128xf32>
    %cst_57 = arith.constant 1.000000e+00 : f32
    %135 = vector.broadcast %cst_57 : f32 to vector<8x128xf32>
    %136 = arith.addf %135, %134 : vector<8x128xf32>
    %137 = arith.divf %135, %136 : vector<8x128xf32>
    %138 = vector.extract_strided_slice %131 {offsets = [0, 128], sizes = [8, 128], strides = [1, 1]} : vector<8x512xf32> to vector<8x128xf32>
    %139 = arith.negf %138 : vector<8x128xf32>
    %140 = math.exp %139 : vector<8x128xf32>
    %cst_58 = arith.constant 1.000000e+00 : f32
    %141 = vector.broadcast %cst_58 : f32 to vector<8x128xf32>
    %142 = arith.addf %141, %140 : vector<8x128xf32>
    %143 = arith.divf %141, %142 : vector<8x128xf32>
    %144 = vector.extract_strided_slice %131 {offsets = [0, 256], sizes = [8, 128], strides = [1, 1]} : vector<8x512xf32> to vector<8x128xf32>
    %145 = math.tanh %144 : vector<8x128xf32>
    %146 = vector.extract_strided_slice %131 {offsets = [0, 384], sizes = [8, 128], strides = [1, 1]} : vector<8x512xf32> to vector<8x128xf32>
    %147 = arith.negf %146 : vector<8x128xf32>
    %148 = math.exp %147 : vector<8x128xf32>
    %cst_59 = arith.constant 1.000000e+00 : f32
    %149 = vector.broadcast %cst_59 : f32 to vector<8x128xf32>
    %150 = arith.addf %149, %148 : vector<8x128xf32>
    %151 = arith.divf %149, %150 : vector<8x128xf32>
    %152 = arith.mulf %143, %125 : vector<8x128xf32>
    %153 = arith.mulf %137, %145 : vector<8x128xf32>
    %154 = arith.addf %152, %153 : vector<8x128xf32>
    %155 = math.tanh %154 : vector<8x128xf32>
    %156 = arith.mulf %151, %155 : vector<8x128xf32>
    %157 = arith.truncf %156 : vector<8x128xf32> to vector<8x128xbf16>
    %158 = arith.index_cast %c3_i32 : i32 to index
    %c0_60 = arith.constant 0 : index
    %c0_61 = arith.constant 0 : index
    %159 = vector.load %arg4[%158, %c0_60, %c0_61] : memref<8x8x128xbf16, #tpu.memory_space<vmem>>, vector<1x8x128xbf16>
    %160 = vector.shape_cast %159 : vector<1x8x128xbf16> to vector<8x128xbf16>
    %161 = vector.shape_cast %157 : vector<8x128xbf16> to vector<1x8x128xbf16>
    tpu.vector_store %arg4[%158, %c0_60, %c0_61], %161 {strides = array<i32>} : memref<8x8x128xbf16, #tpu.memory_space<vmem>>, vector<1x8x128xbf16>,
    %c0_62 = arith.constant 0 : index
    %c0_63 = arith.constant 0 : index
    %162 = vector.load %arg7[%c0_62, %c0_63] : memref<8x128xf32, #tpu.memory_space<vmem>>, vector<8x128xf32>
    tpu.vector_store %arg7[%c0_62, %c0_63], %156 {strides = array<i32>} : memref<8x128xf32, #tpu.memory_space<vmem>>, vector<8x128xf32>,
    %c0_64 = arith.constant 0 : index
    %c0_65 = arith.constant 0 : index
    %163 = vector.load %arg8[%c0_64, %c0_65] : memref<8x128xf32, #tpu.memory_space<vmem>>, vector<8x128xf32>
    tpu.vector_store %arg8[%c0_64, %c0_65], %154 {strides = array<i32>} : memref<8x128xf32, #tpu.memory_space<vmem>>, vector<8x128xf32>,
    %c4_i32 = arith.constant 4 : i32
    %c0_66 = arith.constant 0 : index
    %c0_67 = arith.constant 0 : index
    %164 = vector.load %arg7[%c0_66, %c0_67] : memref<8x128xf32, #tpu.memory_space<vmem>>, vector<8x128xf32>
    %c0_68 = arith.constant 0 : index
    %c0_69 = arith.constant 0 : index
    %165 = vector.load %arg8[%c0_68, %c0_69] : memref<8x128xf32, #tpu.memory_space<vmem>>, vector<8x128xf32>
    %166 = arith.index_cast %c4_i32 : i32 to index
    %c0_70 = arith.constant 0 : index
    %c0_71 = arith.constant 0 : index
    %167 = vector.load %arg2[%166, %c0_70, %c0_71] : memref<8x8x512xf32, #tpu.memory_space<vmem>>, vector<1x8x512xf32>
    %168 = vector.shape_cast %167 : vector<1x8x512xf32> to vector<8x512xf32>
    %169 = arith.truncf %164 : vector<8x128xf32> to vector<8x128xbf16>
    %cst_72 = arith.constant dense<0.000000e+00> : vector<8x512xf32>
    %170 = tpu.matmul %169, %3, %cst_72 {dimension_numbers = #tpu.dot_dimension_numbers<[1], [0], [0], [1], [0, 0, 1, 1], [], []>} : vector<8x128xbf16>, vector<128x512xbf16>, vector<8x512xf32> -> vector<8x512xf32>
    %171 = arith.addf %168, %170 : vector<8x512xf32>
    %172 = vector.extract_strided_slice %171 {offsets = [0, 0], sizes = [8, 128], strides = [1, 1]} : vector<8x512xf32> to vector<8x128xf32>
    %173 = arith.negf %172 : vector<8x128xf32>
    %174 = math.exp %173 : vector<8x128xf32>
    %cst_73 = arith.constant 1.000000e+00 : f32
    %175 = vector.broadcast %cst_73 : f32 to vector<8x128xf32>
    %176 = arith.addf %175, %174 : vector<8x128xf32>
    %177 = arith.divf %175, %176 : vector<8x128xf32>
    %178 = vector.extract_strided_slice %171 {offsets = [0, 128], sizes = [8, 128], strides = [1, 1]} : vector<8x512xf32> to vector<8x128xf32>
    %179 = arith.negf %178 : vector<8x128xf32>
    %180 = math.exp %179 : vector<8x128xf32>
    %cst_74 = arith.constant 1.000000e+00 : f32
    %181 = vector.broadcast %cst_74 : f32 to vector<8x128xf32>
    %182 = arith.addf %181, %180 : vector<8x128xf32>
    %183 = arith.divf %181, %182 : vector<8x128xf32>
    %184 = vector.extract_strided_slice %171 {offsets = [0, 256], sizes = [8, 128], strides = [1, 1]} : vector<8x512xf32> to vector<8x128xf32>
    %185 = math.tanh %184 : vector<8x128xf32>
    %186 = vector.extract_strided_slice %171 {offsets = [0, 384], sizes = [8, 128], strides = [1, 1]} : vector<8x512xf32> to vector<8x128xf32>
    %187 = arith.negf %186 : vector<8x128xf32>
    %188 = math.exp %187 : vector<8x128xf32>
    %cst_75 = arith.constant 1.000000e+00 : f32
    %189 = vector.broadcast %cst_75 : f32 to vector<8x128xf32>
    %190 = arith.addf %189, %188 : vector<8x128xf32>
    %191 = arith.divf %189, %190 : vector<8x128xf32>
    %192 = arith.mulf %183, %165 : vector<8x128xf32>
    %193 = arith.mulf %177, %185 : vector<8x128xf32>
    %194 = arith.addf %192, %193 : vector<8x128xf32>
    %195 = math.tanh %194 : vector<8x128xf32>
    %196 = arith.mulf %191, %195 : vector<8x128xf32>
    %197 = arith.truncf %196 : vector<8x128xf32> to vector<8x128xbf16>
    %198 = arith.index_cast %c4_i32 : i32 to index
    %c0_76 = arith.constant 0 : index
    %c0_77 = arith.constant 0 : index
    %199 = vector.load %arg4[%198, %c0_76, %c0_77] : memref<8x8x128xbf16, #tpu.memory_space<vmem>>, vector<1x8x128xbf16>
    %200 = vector.shape_cast %199 : vector<1x8x128xbf16> to vector<8x128xbf16>
    %201 = vector.shape_cast %197 : vector<8x128xbf16> to vector<1x8x128xbf16>
    tpu.vector_store %arg4[%198, %c0_76, %c0_77], %201 {strides = array<i32>} : memref<8x8x128xbf16, #tpu.memory_space<vmem>>, vector<1x8x128xbf16>,
    %c0_78 = arith.constant 0 : index
    %c0_79 = arith.constant 0 : index
    %202 = vector.load %arg7[%c0_78, %c0_79] : memref<8x128xf32, #tpu.memory_space<vmem>>, vector<8x128xf32>
    tpu.vector_store %arg7[%c0_78, %c0_79], %196 {strides = array<i32>} : memref<8x128xf32, #tpu.memory_space<vmem>>, vector<8x128xf32>,
    %c0_80 = arith.constant 0 : index
    %c0_81 = arith.constant 0 : index
    %203 = vector.load %arg8[%c0_80, %c0_81] : memref<8x128xf32, #tpu.memory_space<vmem>>, vector<8x128xf32>
    tpu.vector_store %arg8[%c0_80, %c0_81], %194 {strides = array<i32>} : memref<8x128xf32, #tpu.memory_space<vmem>>, vector<8x128xf32>,
    %c5_i32 = arith.constant 5 : i32
    %c0_82 = arith.constant 0 : index
    %c0_83 = arith.constant 0 : index
    %204 = vector.load %arg7[%c0_82, %c0_83] : memref<8x128xf32, #tpu.memory_space<vmem>>, vector<8x128xf32>
    %c0_84 = arith.constant 0 : index
    %c0_85 = arith.constant 0 : index
    %205 = vector.load %arg8[%c0_84, %c0_85] : memref<8x128xf32, #tpu.memory_space<vmem>>, vector<8x128xf32>
    %206 = arith.index_cast %c5_i32 : i32 to index
    %c0_86 = arith.constant 0 : index
    %c0_87 = arith.constant 0 : index
    %207 = vector.load %arg2[%206, %c0_86, %c0_87] : memref<8x8x512xf32, #tpu.memory_space<vmem>>, vector<1x8x512xf32>
    %208 = vector.shape_cast %207 : vector<1x8x512xf32> to vector<8x512xf32>
    %209 = arith.truncf %204 : vector<8x128xf32> to vector<8x128xbf16>
    %cst_88 = arith.constant dense<0.000000e+00> : vector<8x512xf32>
    %210 = tpu.matmul %209, %3, %cst_88 {dimension_numbers = #tpu.dot_dimension_numbers<[1], [0], [0], [1], [0, 0, 1, 1], [], []>} : vector<8x128xbf16>, vector<128x512xbf16>, vector<8x512xf32> -> vector<8x512xf32>
    %211 = arith.addf %208, %210 : vector<8x512xf32>
    %212 = vector.extract_strided_slice %211 {offsets = [0, 0], sizes = [8, 128], strides = [1, 1]} : vector<8x512xf32> to vector<8x128xf32>
    %213 = arith.negf %212 : vector<8x128xf32>
    %214 = math.exp %213 : vector<8x128xf32>
    %cst_89 = arith.constant 1.000000e+00 : f32
    %215 = vector.broadcast %cst_89 : f32 to vector<8x128xf32>
    %216 = arith.addf %215, %214 : vector<8x128xf32>
    %217 = arith.divf %215, %216 : vector<8x128xf32>
    %218 = vector.extract_strided_slice %211 {offsets = [0, 128], sizes = [8, 128], strides = [1, 1]} : vector<8x512xf32> to vector<8x128xf32>
    %219 = arith.negf %218 : vector<8x128xf32>
    %220 = math.exp %219 : vector<8x128xf32>
    %cst_90 = arith.constant 1.000000e+00 : f32
    %221 = vector.broadcast %cst_90 : f32 to vector<8x128xf32>
    %222 = arith.addf %221, %220 : vector<8x128xf32>
    %223 = arith.divf %221, %222 : vector<8x128xf32>
    %224 = vector.extract_strided_slice %211 {offsets = [0, 256], sizes = [8, 128], strides = [1, 1]} : vector<8x512xf32> to vector<8x128xf32>
    %225 = math.tanh %224 : vector<8x128xf32>
    %226 = vector.extract_strided_slice %211 {offsets = [0, 384], sizes = [8, 128], strides = [1, 1]} : vector<8x512xf32> to vector<8x128xf32>
    %227 = arith.negf %226 : vector<8x128xf32>
    %228 = math.exp %227 : vector<8x128xf32>
    %cst_91 = arith.constant 1.000000e+00 : f32
    %229 = vector.broadcast %cst_91 : f32 to vector<8x128xf32>
    %230 = arith.addf %229, %228 : vector<8x128xf32>
    %231 = arith.divf %229, %230 : vector<8x128xf32>
    %232 = arith.mulf %223, %205 : vector<8x128xf32>
    %233 = arith.mulf %217, %225 : vector<8x128xf32>
    %234 = arith.addf %232, %233 : vector<8x128xf32>
    %235 = math.tanh %234 : vector<8x128xf32>
    %236 = arith.mulf %231, %235 : vector<8x128xf32>
    %237 = arith.truncf %236 : vector<8x128xf32> to vector<8x128xbf16>
    %238 = arith.index_cast %c5_i32 : i32 to index
    %c0_92 = arith.constant 0 : index
    %c0_93 = arith.constant 0 : index
    %239 = vector.load %arg4[%238, %c0_92, %c0_93] : memref<8x8x128xbf16, #tpu.memory_space<vmem>>, vector<1x8x128xbf16>
    %240 = vector.shape_cast %239 : vector<1x8x128xbf16> to vector<8x128xbf16>
    %241 = vector.shape_cast %237 : vector<8x128xbf16> to vector<1x8x128xbf16>
    tpu.vector_store %arg4[%238, %c0_92, %c0_93], %241 {strides = array<i32>} : memref<8x8x128xbf16, #tpu.memory_space<vmem>>, vector<1x8x128xbf16>,
    %c0_94 = arith.constant 0 : index
    %c0_95 = arith.constant 0 : index
    %242 = vector.load %arg7[%c0_94, %c0_95] : memref<8x128xf32, #tpu.memory_space<vmem>>, vector<8x128xf32>
    tpu.vector_store %arg7[%c0_94, %c0_95], %236 {strides = array<i32>} : memref<8x128xf32, #tpu.memory_space<vmem>>, vector<8x128xf32>,
    %c0_96 = arith.constant 0 : index
    %c0_97 = arith.constant 0 : index
    %243 = vector.load %arg8[%c0_96, %c0_97] : memref<8x128xf32, #tpu.memory_space<vmem>>, vector<8x128xf32>
    tpu.vector_store %arg8[%c0_96, %c0_97], %234 {strides = array<i32>} : memref<8x128xf32, #tpu.memory_space<vmem>>, vector<8x128xf32>,
    %c6_i32 = arith.constant 6 : i32
    %c0_98 = arith.constant 0 : index
    %c0_99 = arith.constant 0 : index
    %244 = vector.load %arg7[%c0_98, %c0_99] : memref<8x128xf32, #tpu.memory_space<vmem>>, vector<8x128xf32>
    %c0_100 = arith.constant 0 : index
    %c0_101 = arith.constant 0 : index
    %245 = vector.load %arg8[%c0_100, %c0_101] : memref<8x128xf32, #tpu.memory_space<vmem>>, vector<8x128xf32>
    %246 = arith.index_cast %c6_i32 : i32 to index
    %c0_102 = arith.constant 0 : index
    %c0_103 = arith.constant 0 : index
    %247 = vector.load %arg2[%246, %c0_102, %c0_103] : memref<8x8x512xf32, #tpu.memory_space<vmem>>, vector<1x8x512xf32>
    %248 = vector.shape_cast %247 : vector<1x8x512xf32> to vector<8x512xf32>
    %249 = arith.truncf %244 : vector<8x128xf32> to vector<8x128xbf16>
    %cst_104 = arith.constant dense<0.000000e+00> : vector<8x512xf32>
    %250 = tpu.matmul %249, %3, %cst_104 {dimension_numbers = #tpu.dot_dimension_numbers<[1], [0], [0], [1], [0, 0, 1, 1], [], []>} : vector<8x128xbf16>, vector<128x512xbf16>, vector<8x512xf32> -> vector<8x512xf32>
    %251 = arith.addf %248, %250 : vector<8x512xf32>
    %252 = vector.extract_strided_slice %251 {offsets = [0, 0], sizes = [8, 128], strides = [1, 1]} : vector<8x512xf32> to vector<8x128xf32>
    %253 = arith.negf %252 : vector<8x128xf32>
    %254 = math.exp %253 : vector<8x128xf32>
    %cst_105 = arith.constant 1.000000e+00 : f32
    %255 = vector.broadcast %cst_105 : f32 to vector<8x128xf32>
    %256 = arith.addf %255, %254 : vector<8x128xf32>
    %257 = arith.divf %255, %256 : vector<8x128xf32>
    %258 = vector.extract_strided_slice %251 {offsets = [0, 128], sizes = [8, 128], strides = [1, 1]} : vector<8x512xf32> to vector<8x128xf32>
    %259 = arith.negf %258 : vector<8x128xf32>
    %260 = math.exp %259 : vector<8x128xf32>
    %cst_106 = arith.constant 1.000000e+00 : f32
    %261 = vector.broadcast %cst_106 : f32 to vector<8x128xf32>
    %262 = arith.addf %261, %260 : vector<8x128xf32>
    %263 = arith.divf %261, %262 : vector<8x128xf32>
    %264 = vector.extract_strided_slice %251 {offsets = [0, 256], sizes = [8, 128], strides = [1, 1]} : vector<8x512xf32> to vector<8x128xf32>
    %265 = math.tanh %264 : vector<8x128xf32>
    %266 = vector.extract_strided_slice %251 {offsets = [0, 384], sizes = [8, 128], strides = [1, 1]} : vector<8x512xf32> to vector<8x128xf32>
    %267 = arith.negf %266 : vector<8x128xf32>
    %268 = math.exp %267 : vector<8x128xf32>
    %cst_107 = arith.constant 1.000000e+00 : f32
    %269 = vector.broadcast %cst_107 : f32 to vector<8x128xf32>
    %270 = arith.addf %269, %268 : vector<8x128xf32>
    %271 = arith.divf %269, %270 : vector<8x128xf32>
    %272 = arith.mulf %263, %245 : vector<8x128xf32>
    %273 = arith.mulf %257, %265 : vector<8x128xf32>
    %274 = arith.addf %272, %273 : vector<8x128xf32>
    %275 = math.tanh %274 : vector<8x128xf32>
    %276 = arith.mulf %271, %275 : vector<8x128xf32>
    %277 = arith.truncf %276 : vector<8x128xf32> to vector<8x128xbf16>
    %278 = arith.index_cast %c6_i32 : i32 to index
    %c0_108 = arith.constant 0 : index
    %c0_109 = arith.constant 0 : index
    %279 = vector.load %arg4[%278, %c0_108, %c0_109] : memref<8x8x128xbf16, #tpu.memory_space<vmem>>, vector<1x8x128xbf16>
    %280 = vector.shape_cast %279 : vector<1x8x128xbf16> to vector<8x128xbf16>
    %281 = vector.shape_cast %277 : vector<8x128xbf16> to vector<1x8x128xbf16>
    tpu.vector_store %arg4[%278, %c0_108, %c0_109], %281 {strides = array<i32>} : memref<8x8x128xbf16, #tpu.memory_space<vmem>>, vector<1x8x128xbf16>,
    %c0_110 = arith.constant 0 : index
    %c0_111 = arith.constant 0 : index
    %282 = vector.load %arg7[%c0_110, %c0_111] : memref<8x128xf32, #tpu.memory_space<vmem>>, vector<8x128xf32>
    tpu.vector_store %arg7[%c0_110, %c0_111], %276 {strides = array<i32>} : memref<8x128xf32, #tpu.memory_space<vmem>>, vector<8x128xf32>,
    %c0_112 = arith.constant 0 : index
    %c0_113 = arith.constant 0 : index
    %283 = vector.load %arg8[%c0_112, %c0_113] : memref<8x128xf32, #tpu.memory_space<vmem>>, vector<8x128xf32>
    tpu.vector_store %arg8[%c0_112, %c0_113], %274 {strides = array<i32>} : memref<8x128xf32, #tpu.memory_space<vmem>>, vector<8x128xf32>,
    %c7_i32 = arith.constant 7 : i32
    %c0_114 = arith.constant 0 : index
    %c0_115 = arith.constant 0 : index
    %284 = vector.load %arg7[%c0_114, %c0_115] : memref<8x128xf32, #tpu.memory_space<vmem>>, vector<8x128xf32>
    %c0_116 = arith.constant 0 : index
    %c0_117 = arith.constant 0 : index
    %285 = vector.load %arg8[%c0_116, %c0_117] : memref<8x128xf32, #tpu.memory_space<vmem>>, vector<8x128xf32>
    %286 = arith.index_cast %c7_i32 : i32 to index
    %c0_118 = arith.constant 0 : index
    %c0_119 = arith.constant 0 : index
    %287 = vector.load %arg2[%286, %c0_118, %c0_119] : memref<8x8x512xf32, #tpu.memory_space<vmem>>, vector<1x8x512xf32>
    %288 = vector.shape_cast %287 : vector<1x8x512xf32> to vector<8x512xf32>
    %289 = arith.truncf %284 : vector<8x128xf32> to vector<8x128xbf16>
    %cst_120 = arith.constant dense<0.000000e+00> : vector<8x512xf32>
    %290 = tpu.matmul %289, %3, %cst_120 {dimension_numbers = #tpu.dot_dimension_numbers<[1], [0], [0], [1], [0, 0, 1, 1], [], []>} : vector<8x128xbf16>, vector<128x512xbf16>, vector<8x512xf32> -> vector<8x512xf32>
    %291 = arith.addf %288, %290 : vector<8x512xf32>
    %292 = vector.extract_strided_slice %291 {offsets = [0, 0], sizes = [8, 128], strides = [1, 1]} : vector<8x512xf32> to vector<8x128xf32>
    %293 = arith.negf %292 : vector<8x128xf32>
    %294 = math.exp %293 : vector<8x128xf32>
    %cst_121 = arith.constant 1.000000e+00 : f32
    %295 = vector.broadcast %cst_121 : f32 to vector<8x128xf32>
    %296 = arith.addf %295, %294 : vector<8x128xf32>
    %297 = arith.divf %295, %296 : vector<8x128xf32>
    %298 = vector.extract_strided_slice %291 {offsets = [0, 128], sizes = [8, 128], strides = [1, 1]} : vector<8x512xf32> to vector<8x128xf32>
    %299 = arith.negf %298 : vector<8x128xf32>
    %300 = math.exp %299 : vector<8x128xf32>
    %cst_122 = arith.constant 1.000000e+00 : f32
    %301 = vector.broadcast %cst_122 : f32 to vector<8x128xf32>
    %302 = arith.addf %301, %300 : vector<8x128xf32>
    %303 = arith.divf %301, %302 : vector<8x128xf32>
    %304 = vector.extract_strided_slice %291 {offsets = [0, 256], sizes = [8, 128], strides = [1, 1]} : vector<8x512xf32> to vector<8x128xf32>
    %305 = math.tanh %304 : vector<8x128xf32>
    %306 = vector.extract_strided_slice %291 {offsets = [0, 384], sizes = [8, 128], strides = [1, 1]} : vector<8x512xf32> to vector<8x128xf32>
    %307 = arith.negf %306 : vector<8x128xf32>
    %308 = math.exp %307 : vector<8x128xf32>
    %cst_123 = arith.constant 1.000000e+00 : f32
    %309 = vector.broadcast %cst_123 : f32 to vector<8x128xf32>
    %310 = arith.addf %309, %308 : vector<8x128xf32>
    %311 = arith.divf %309, %310 : vector<8x128xf32>
    %312 = arith.mulf %303, %285 : vector<8x128xf32>
    %313 = arith.mulf %297, %305 : vector<8x128xf32>
    %314 = arith.addf %312, %313 : vector<8x128xf32>
    %315 = math.tanh %314 : vector<8x128xf32>
    %316 = arith.mulf %311, %315 : vector<8x128xf32>
    %317 = arith.truncf %316 : vector<8x128xf32> to vector<8x128xbf16>
    %318 = arith.index_cast %c7_i32 : i32 to index
    %c0_124 = arith.constant 0 : index
    %c0_125 = arith.constant 0 : index
    %319 = vector.load %arg4[%318, %c0_124, %c0_125] : memref<8x8x128xbf16, #tpu.memory_space<vmem>>, vector<1x8x128xbf16>
    %320 = vector.shape_cast %319 : vector<1x8x128xbf16> to vector<8x128xbf16>
    %321 = vector.shape_cast %317 : vector<8x128xbf16> to vector<1x8x128xbf16>
    tpu.vector_store %arg4[%318, %c0_124, %c0_125], %321 {strides = array<i32>} : memref<8x8x128xbf16, #tpu.memory_space<vmem>>, vector<1x8x128xbf16>,
    %c0_126 = arith.constant 0 : index
    %c0_127 = arith.constant 0 : index
    %322 = vector.load %arg7[%c0_126, %c0_127] : memref<8x128xf32, #tpu.memory_space<vmem>>, vector<8x128xf32>
    tpu.vector_store %arg7[%c0_126, %c0_127], %316 {strides = array<i32>} : memref<8x128xf32, #tpu.memory_space<vmem>>, vector<8x128xf32>,
    %c0_128 = arith.constant 0 : index
    %c0_129 = arith.constant 0 : index
    %323 = vector.load %arg8[%c0_128, %c0_129] : memref<8x128xf32, #tpu.memory_space<vmem>>, vector<8x128xf32>
    tpu.vector_store %arg8[%c0_128, %c0_129], %314 {strides = array<i32>} : memref<8x128xf32, #tpu.memory_space<vmem>>, vector<8x128xf32>,
    %c8_i32 = arith.constant 8 : i32
    %c0_i32_130 = arith.constant 0 : i32
    %324 = arith.cmpi eq, %arg1, %c0_i32_130 : i32
    %325 = arith.extui %324 : i1 to i32
    %c0_i32_131 = arith.constant 0 : i32
    %326 = arith.cmpi ne, %325, %c0_i32_131 : i32
    scf.if %326 {
      %c0_132 = arith.constant 0 : index
      %c0_133 = arith.constant 0 : index
      %327 = vector.load %arg7[%c0_132, %c0_133] : memref<8x128xf32, #tpu.memory_space<vmem>>, vector<8x128xf32>
      %c0_134 = arith.constant 0 : index
      %c0_135 = arith.constant 0 : index
      %328 = vector.load %arg5[%c0_134, %c0_135] : memref<8x128xf32, #tpu.memory_space<vmem>>, vector<8x128xf32>
      tpu.vector_store %arg5[%c0_134, %c0_135], %327 {strides = array<i32>} : memref<8x128xf32, #tpu.memory_space<vmem>>, vector<8x128xf32>,
      %c0_136 = arith.constant 0 : index
      %c0_137 = arith.constant 0 : index
      %329 = vector.load %arg8[%c0_136, %c0_137] : memref<8x128xf32, #tpu.memory_space<vmem>>, vector<8x128xf32>
      %c0_138 = arith.constant 0 : index
      %c0_139 = arith.constant 0 : index
      %330 = vector.load %arg6[%c0_138, %c0_139] : memref<8x128xf32, #tpu.memory_space<vmem>>, vector<8x128xf32>
      tpu.vector_store %arg6[%c0_138, %c0_139], %329 {strides = array<i32>} : memref<8x128xf32, #tpu.memory_space<vmem>>, vector<8x128xf32>,
    } else {
    }
    return
  }
  func.func @transform_0(%arg0: i32, %arg1: i32) -> (i32, i32, i32) {
    %c0_i32 = arith.constant 0 : i32
    %c0_i32_0 = arith.constant 0 : i32
    return %arg1, %arg0, %c0_i32 : i32, i32, i32
  }
  func.func @transform_1(%arg0: i32, %arg1: i32) -> (i32, i32) {
    %c0_i32 = arith.constant 0 : i32
    %c0_i32_0 = arith.constant 0 : i32
    %c0_i32_1 = arith.constant 0 : i32
    return %c0_i32, %c0_i32_0 : i32, i32
  }
  func.func @transform_2(%arg0: i32, %arg1: i32) -> (i32, i32, i32) {
    %c0_i32 = arith.constant 0 : i32
    %c0_i32_0 = arith.constant 0 : i32
    return %arg1, %arg0, %c0_i32 : i32, i32, i32
  }
  func.func @transform_3(%arg0: i32, %arg1: i32) -> (i32, i32) {
    %c0_i32 = arith.constant 0 : i32
    %c0_i32_0 = arith.constant 0 : i32
    return %arg0, %c0_i32 : i32, i32
  }
  func.func @transform_4(%arg0: i32, %arg1: i32) -> (i32, i32) {
    %c0_i32 = arith.constant 0 : i32
    %c0_i32_0 = arith.constant 0 : i32
    return %arg0, %c0_i32 : i32, i32
  }
}

</mosaic_0001>

<bundles_post_ra>
// kernel: sequence_generation_forward.5
= control target key start
LH: loop header
LB: loop body
LE: loop exit
PB: predicated region body
PF: predicated region fallthrough
CT: control target
= control target key end

     0   :  { %v825_v12 = vmov 1966171168   ;;  %v188_v14 = vlaneseq  ;;  %s1159_s1 = inlined_call_operand.vmem [shape: bf16[128,128], index: 1, kind: input, shape index: {}]   ;;  %s1160_s0 = inlined_call_operand.vmem [shape: bf16[8,8,128], index: 0, kind: input, shape index: {}]   ;;  %s1161_s2 = inlined_call_operand.vmem [shape: f32[1,128], index: 2, kind: input, shape index: {}]   ;;  %s1162_s3 = inlined_call_operand.vmem [shape: f32[8,8,128], index: 3, kind: output, shape index: {}]  }
   0x1   :  { %v813_v0 = vld [vmem:[%s1159_s1] sm:$0xff]   ;;  %v814_v1 = vld [vmem:[%s1159_s1 + $0x8] sm:$0xff]   ;;  %v815_v2 = vld [vmem:[%s1159_s1 + $0x10] sm:$0xff]   ;;  %v186_v13 = vunpack.c.l.s4 %v825_v12 }
   0x2   :  { %772 = vmatprep.subr.bf16.mxu0 %v813_v0  ;;  %796 = vmatprep.subr.bf16.mxu1 %v813_v0  ;;  %v816_v3 = vld [vmem:[%s1159_s1 + $0x18] sm:$0xff]   ;;  %v821_v4 = vld [vmem:[%s1160_s0] sm:$0xff]   ;;  %v822_v5 = vld [vmem:[%s1160_s0 + $0x10] sm:$0xff]   ;;  %v189_v16 = vshrl.u32 %v188_v14, 7 }
   0x3   :  { %773 = vmatpush3.bf16.msra.mxu0 %v813_v0  ;;  %804 = vmatpush3.bf16.msra.mxu1 %v813_v0  ;;  %v817_v6 = vld [vmem:[%s1159_s1 + $0x20] sm:$0xff]   ;;  %v818_v7 = vld [vmem:[%s1159_s1 + $0x28] sm:$0xff]   ;;  %v819_v8 = vld [vmem:[%s1159_s1 + $0x30] sm:$0xff]   ;;  %v187_v15 = vunpack.c.0.s8 %v186_v13 }
   0x4   :  { %774 = vmatprep.subr.bf16.mxu0 %v814_v1  ;;  %797 = vmatprep.subr.bf16.mxu1 %v814_v1  ;;  %v820_v9 = vld [vmem:[%s1159_s1 + $0x38] sm:$0xff]   ;;  %v823_v10 = vld [vmem:[%s1160_s0 + $0x8] sm:$0xff]   ;;  %v885_v17 = vld [vmem:[%s1161_s2] ss:$0 sm:$0xff] }
   0x5   :  { %788 = vmatprep.mubr.bf16.mxu0 %v821_v4  ;;  %792 = vmatprep.mubr.bf16.mxu1 %v822_v5  ;;  %v824_v11 = vld [vmem:[%s1160_s0 + $0x18] sm:$0xff]   ;;  %v887_v18 = vsub.s32 %v187_v15, %v189_v16 }
   0x7   :  { %775 = vmatpush3.bf16.msra.mxu0 %v814_v1  ;;  %805 = vmatpush3.bf16.msra.mxu1 %v814_v1 }
   0x8   :  { %776 = vmatprep.subr.bf16.mxu0 %v815_v2  ;;  %798 = vmatprep.subr.bf16.mxu1 %v815_v2 }
   0xb   :  { %777 = vmatpush3.bf16.msra.mxu0 %v815_v2  ;;  %806 = vmatpush3.bf16.msra.mxu1 %v815_v2 }
   0xc   :  { %778 = vmatprep.subr.bf16.mxu0 %v816_v3  ;;  %799 = vmatprep.subr.bf16.mxu1 %v816_v3 }
   0xf   :  { %779 = vmatpush3.bf16.msra.mxu0 %v816_v3  ;;  %807 = vmatpush3.bf16.msra.mxu1 %v816_v3 }
  0x10   :  { %780 = vmatprep.subr.bf16.mxu0 %v817_v6  ;;  %800 = vmatprep.subr.bf16.mxu1 %v817_v6 }
  0x13   :  { %781 = vmatpush3.bf16.msra.mxu0 %v817_v6  ;;  %808 = vmatpush3.bf16.msra.mxu1 %v817_v6 }
  0x14   :  { %782 = vmatprep.subr.bf16.mxu0 %v818_v7  ;;  %801 = vmatprep.subr.bf16.mxu1 %v818_v7 }
  0x17   :  { %783 = vmatpush3.bf16.msra.mxu0 %v818_v7  ;;  %809 = vmatpush3.bf16.msra.mxu1 %v818_v7 }
  0x18   :  { %784 = vmatprep.subr.bf16.mxu0 %v819_v8  ;;  %802 = vmatprep.subr.bf16.mxu1 %v819_v8 }
  0x1b   :  { %785 = vmatpush3.bf16.msra.mxu0 %v819_v8  ;;  %810 = vmatpush3.bf16.msra.mxu1 %v819_v8 }
  0x1c   :  { %786 = vmatprep.subr.bf16.mxu0 %v820_v9  ;;  %803 = vmatprep.subr.bf16.mxu1 %v820_v9 }
  0x1f   :  { %787 = vmatpush3.bf16.msra.mxu0 %v820_v9  ;;  %811 = vmatpush3.bf16.msra.mxu1 %v820_v9 }
  0x22   :  { %789 = vmatmul.mubr.bf16.vlgmr.msra.gmra.mrb[0].mxu0 %v823_v10  ;;  %793 = vmatmul.mubr.bf16.vlgmr.msra.gmra.mrb[0].mxu1 %v824_v11 }
  0xf5   :  { %v790_v19 = vpop.f32.mrb[0].mxu0  ;;  %v794_v20 = vpop.f32.mrb[0].mxu1 }
  0xf6   :  { %v161_v21 = vadd.f32 %v790_v19, %v885_v17  ;;  %v177_v22 = vadd.f32 %v794_v20, %v885_v17  ;;  %v152_v23 = vpop.f32.mrb[1].mxu0  ;;  %v168_v24 = vpop.f32.mrb[1].mxu1 }
  0xf7   :  { %v153_v25 = vadd.f32 %v885_v17, %v152_v23  ;;  %v893_v26 = vadd.f32 %v885_v17, %v168_v24  ;;  %v895_v27 = vpop.f32.mrb[2].mxu0  ;;  %v897_v28 = vpop.f32.mrb[2].mxu1 }
  0xf8   :  { %v316_v29 = vcombine.high %v161_v21, %v161_v21  ;;  %v323_v30 = vrot.slane %v161_v21, %v887_v18  ;;  %v580_v31 = vcombine.high %v177_v22, %v177_v22  ;;  %v587_v32 = vrot.slane %v177_v22, %v887_v18  ;;  %v901_v33 = vpop.f32.mrb[3].mxu0  ;;  %v903_v34 = vpop.f32.mrb[3].mxu1 }
  0xf9   :  { %v184_v35 = vcombine.high %v153_v25, %v153_v25  ;;  %v191_v36 = vrot.slane %v153_v25, %v887_v18  ;;  %v448_v37 = vcombine.high %v893_v26, %v893_v26  ;;  %v455_v38 = vrot.slane %v893_v26, %v887_v18 }
  0xfa   :  { %v330_v39 = vrot.slane %v316_v29, %v887_v18  ;;  %v331_v40 = vcombine.high %v323_v30, %v323_v30  ;;  %v339_v41 = vrot.slane %v323_v30, %v887_v18  ;;  %736 = vst.sshfl [vmem:[%s1162_s3 + $0x2] sm:$0x1 pattern:$0x73625140] %v323_v30  ;;  %v594_v42 = vrot.slane %v580_v31, %v887_v18 }
  0xfb   :  { %752 = vst.sshfl [vmem:[%s1162_s3 + $0x6] sm:$0x1 pattern:$0x73625140] %v587_v32  ;;  %v595_v43 = vcombine.high %v587_v32, %v587_v32  ;;  %v603_v44 = vrot.slane %v587_v32, %v887_v18  ;;  %v198_v45 = vrot.slane %v184_v35, %v887_v18  ;;  %v199_v46 = vcombine.high %v191_v36, %v191_v36 }
  0xfc   :  { %728 = vst.sshfl [vmem:[%s1162_s3] sm:$0x1 pattern:$0x73625140] %v191_v36  ;;  %v332_v47 = vcombine.high %v330_v39, %v330_v39  ;;  %v346_v48 = vrot.slane %v330_v39, %v887_v18  ;;  %v353_v49 = vrot.slane %v331_v40, %v887_v18  ;;  %v361_v50 = vcombine.high %v339_v41, %v339_v41 }
  0xfd   :  { %744 = vst.sshfl [vmem:[%s1162_s3 + $0x4] sm:$0x1 pattern:$0x73625140] %v455_v38  ;;  %v596_v51 = vcombine.high %v594_v42, %v594_v42  ;;  %v610_v52 = vrot.slane %v594_v42, %v887_v18  ;;  %v617_v53 = vrot.slane %v595_v43, %v887_v18  ;;  %v625_v54 = vcombine.high %v603_v44, %v603_v44 }
  0xfe   :  { %737 = vst.sshfl [vmem:[%s1162_s3 + $0xa] sm:$0x1 pattern:$0x73625140] %v331_v40  ;;  %v360_v55 = vrot.slane %v332_v47, %v887_v18  ;;  %v362_v56 = vcombine.high %v346_v48, %v346_v48  ;;  %v363_v57 = vcombine.high %v353_v49, %v353_v49  ;;  %375 = vst [vmem:[%s1162_s3 + $0x12] sm:$0x1] %v361_v50 }
  0xff   :  { %738 = vst.sshfl [vmem:[%s1162_s3 + $0x22] sm:$0x1 pattern:$0x73625140] %v330_v39  ;;  %v200_v58 = vcombine.high %v198_v45, %v198_v45  ;;  %v624_v59 = vrot.slane %v596_v51, %v887_v18  ;;  %v626_v60 = vcombine.high %v610_v52, %v610_v52  ;;  %v627_v61 = vcombine.high %v617_v53, %v617_v53 }
 0x100   :  { %754 = vst.sshfl [vmem:[%s1162_s3 + $0x26] sm:$0x1 pattern:$0x73625140] %v594_v42  ;;  %639 = vst [vmem:[%s1162_s3 + $0x16] sm:$0x1] %v625_v54  ;;  %v207_v62 = vrot.slane %v191_v36, %v887_v18  ;;  %v364_v63 = vcombine.high %v360_v55, %v360_v55  ;;  %v214_v0 = vrot.slane %v198_v45, %v887_v18 }
 0x101   :  { %753 = vst.sshfl [vmem:[%s1162_s3 + $0xe] sm:$0x1 pattern:$0x73625140] %v595_v43  ;;  %376 = vst [vmem:[%s1162_s3 + $0x1a] sm:$0x1] %v363_v57  ;;  %v221_v1 = vrot.slane %v199_v46, %v887_v18  ;;  %v228_v2 = vrot.slane %v200_v58, %v887_v18  ;;  %v628_v3 = vcombine.high %v624_v59, %v624_v59 }
 0x102   :  { %729 = vst.sshfl [vmem:[%s1162_s3 + $0x8] sm:$0x1 pattern:$0x73625140] %v199_v46  ;;  %379 = vst [vmem:[%s1162_s3 + $0x32] sm:$0x1] %v362_v56  ;;  %v229_v4 = vcombine.high %v207_v62, %v207_v62  ;;  %v462_v5 = vrot.slane %v448_v37, %v887_v18  ;;  %v463_v6 = vcombine.high %v455_v38, %v455_v38 }
 0x103   :  { %730 = vst.sshfl [vmem:[%s1162_s3 + $0x20] sm:$0x1 pattern:$0x73625140] %v198_v45  ;;  %640 = vst [vmem:[%s1162_s3 + $0x1e] sm:$0x1] %v627_v61  ;;  %v230_v7 = vcombine.high %v214_v0, %v214_v0  ;;  %v231_v8 = vcombine.high %v221_v1, %v221_v1  ;;  %v232_v9 = vcombine.high %v228_v2, %v228_v2 }
 0x104   :  { %739 = vst.sshfl [vmem:[%s1162_s3 + $0x2a] sm:$0x1 pattern:$0x73625140] %v332_v47  ;;  %643 = vst [vmem:[%s1162_s3 + $0x36] sm:$0x1] %v626_v60  ;;  %v471_v10 = vrot.slane %v455_v38, %v887_v18  ;;  %v464_v11 = vcombine.high %v462_v5, %v462_v5  ;;  %v478_v12 = vrot.slane %v462_v5, %v887_v18 }
 0x105   :  { %755 = vst.sshfl [vmem:[%s1162_s3 + $0x2e] sm:$0x1 pattern:$0x73625140] %v596_v51  ;;  %380 = vst [vmem:[%s1162_s3 + $0x3a] sm:$0x1] %v364_v63  ;;  %v485_v13 = vrot.slane %v463_v6, %v887_v18  ;;  %v164_v14 = vadd.f32 %v895_v27, %v885_v17  ;;  %v180_v16 = vadd.f32 %v897_v28, %v885_v17 }
 0x106   :  { %731 = vst.sshfl [vmem:[%s1162_s3 + $0x28] sm:$0x1 pattern:$0x73625140] %v200_v58  ;;  %644 = vst [vmem:[%s1162_s3 + $0x3e] sm:$0x1] %v628_v3  ;;  %v493_v15 = vcombine.high %v471_v10, %v471_v10  ;;  %v156_v19 = vadd.f32 %v885_v17, %v901_v33  ;;  %v1018_v20 = vadd.f32 %v885_v17, %v903_v34 }
 0x107   :  { %243 = vst [vmem:[%s1162_s3 + $0x10] sm:$0x1] %v229_v4  ;;  %745 = vst.sshfl [vmem:[%s1162_s3 + $0xc] sm:$0x1 pattern:$0x73625140] %v463_v6  ;;  %v492_v21 = vrot.slane %v464_v11, %v887_v18  ;;  %v494_v22 = vcombine.high %v478_v12, %v478_v12  ;;  %v495_v23 = vcombine.high %v485_v13, %v485_v13 }
 0x108   :  { %746 = vst.sshfl [vmem:[%s1162_s3 + $0x24] sm:$0x1 pattern:$0x73625140] %v462_v5  ;;  %244 = vst [vmem:[%s1162_s3 + $0x18] sm:$0x1] %v231_v8  ;;  %v382_v24 = vcombine.high %v164_v14, %v164_v14  ;;  %v389_v25 = vrot.slane %v164_v14, %v887_v18  ;;  %v646_v26 = vcombine.high %v180_v16, %v180_v16 }
 0x109   :  { %247 = vst [vmem:[%s1162_s3 + $0x30] sm:$0x1] %v230_v7  ;;  %248 = vst [vmem:[%s1162_s3 + $0x38] sm:$0x1] %v232_v9  ;;  %v653_v27 = vrot.slane %v180_v16, %v887_v18  ;;  %v250_v17 = vcombine.high %v156_v19, %v156_v19  ;;  %v496_v28 = vcombine.high %v492_v21, %v492_v21 }
 0x10a   :  { %747 = vst.sshfl [vmem:[%s1162_s3 + $0x2c] sm:$0x1 pattern:$0x73625140] %v464_v11  ;;  %507 = vst [vmem:[%s1162_s3 + $0x14] sm:$0x1] %v493_v15  ;;  %v396_v29 = vrot.slane %v382_v24, %v887_v18  ;;  %v257_v30 = vrot.slane %v156_v19, %v887_v18  ;;  %v514_v31 = vcombine.high %v1018_v20, %v1018_v20 }
 0x10b   :  { %508 = vst [vmem:[%s1162_s3 + $0x1c] sm:$0x1] %v495_v23  ;;  %511 = vst [vmem:[%s1162_s3 + $0x34] sm:$0x1] %v494_v22  ;;  %v397_v32 = vcombine.high %v389_v25, %v389_v25  ;;  %v405_v33 = vrot.slane %v389_v25, %v887_v18  ;;  %v660_v34 = vrot.slane %v646_v26, %v887_v18 }
 0x10c   :  { %740 = vst.sshfl [vmem:[%s1162_s3 + $0x3] sm:$0x1 pattern:$0x73625140] %v389_v25  ;;  %v661_v35 = vcombine.high %v653_v27, %v653_v27  ;;  %512 = vst [vmem:[%s1162_s3 + $0x3c] sm:$0x1] %v496_v28  ;;  %v398_v36 = vcombine.high %v396_v29, %v396_v29  ;;  %v412_v37 = vrot.slane %v396_v29, %v887_v18 }
 0x10d   :  { %756 = vst.sshfl [vmem:[%s1162_s3 + $0x7] sm:$0x1 pattern:$0x73625140] %v653_v27  ;;  %v669_v38 = vrot.slane %v653_v27, %v887_v18  ;;  %v264_v39 = vrot.slane %v250_v17, %v887_v18  ;;  %v419_v40 = vrot.slane %v397_v32, %v887_v18  ;;  %v427_v41 = vcombine.high %v405_v33, %v405_v33 }
 0x10e   :  { %742 = vst.sshfl [vmem:[%s1162_s3 + $0x23] sm:$0x1 pattern:$0x73625140] %v396_v29  ;;  %v662_v42 = vcombine.high %v660_v34, %v660_v34  ;;  %v676_v43 = vrot.slane %v660_v34, %v887_v18  ;;  %v426_v44 = vrot.slane %v398_v36, %v887_v18  ;;  %v428_v45 = vcombine.high %v412_v37, %v412_v37 }
 0x10f   :  { %732 = vst.sshfl [vmem:[%s1162_s3 + $0x1] sm:$0x1 pattern:$0x73625140] %v257_v30  ;;  %v683_v46 = vrot.slane %v661_v35, %v887_v18  ;;  %v691_v47 = vcombine.high %v669_v38, %v669_v38  ;;  %v429_v48 = vcombine.high %v419_v40, %v419_v40  ;;  %441 = vst [vmem:[%s1162_s3 + $0x13] sm:$0x1] %v427_v41 }
 0x110   :  { %741 = vst.sshfl [vmem:[%s1162_s3 + $0xb] sm:$0x1 pattern:$0x73625140] %v397_v32  ;;  %v690_v49 = vrot.slane %v662_v42, %v887_v18  ;;  %v692_v50 = vcombine.high %v676_v43, %v676_v43  ;;  %v265_v51 = vcombine.high %v257_v30, %v257_v30  ;;  %v430_v52 = vcombine.high %v426_v44, %v426_v44 }
 0x111   :  { %757 = vst.sshfl [vmem:[%s1162_s3 + $0xf] sm:$0x1 pattern:$0x73625140] %v661_v35  ;;  %445 = vst [vmem:[%s1162_s3 + $0x33] sm:$0x1] %v428_v45  ;;  %v693_v53 = vcombine.high %v683_v46, %v683_v46  ;;  %v266_v54 = vcombine.high %v264_v39, %v264_v39  ;;  %v273_v55 = vrot.slane %v257_v30, %v887_v18 }
 0x112   :  { %758 = vst.sshfl [vmem:[%s1162_s3 + $0x27] sm:$0x1 pattern:$0x73625140] %v660_v34  ;;  %705 = vst [vmem:[%s1162_s3 + $0x17] sm:$0x1] %v691_v47  ;;  %v694_v56 = vcombine.high %v690_v49, %v690_v49  ;;  %v280_v57 = vrot.slane %v264_v39, %v887_v18  ;;  %v287_v58 = vrot.slane %v265_v51, %v887_v18 }
 0x113   :  { %743 = vst.sshfl [vmem:[%s1162_s3 + $0x2b] sm:$0x1 pattern:$0x73625140] %v398_v36  ;;  %442 = vst [vmem:[%s1162_s3 + $0x1b] sm:$0x1] %v429_v48  ;;  %v521_v59 = vrot.slane %v1018_v20, %v887_v18  ;;  %v294_v60 = vrot.slane %v266_v54, %v887_v18  ;;  %v295_v61 = vcombine.high %v273_v55, %v273_v55 }
 0x114   :  { %734 = vst.sshfl [vmem:[%s1162_s3 + $0x21] sm:$0x1 pattern:$0x73625140] %v264_v39  ;;  %709 = vst [vmem:[%s1162_s3 + $0x37] sm:$0x1] %v692_v50  ;;  %v528_v62 = vrot.slane %v514_v31, %v887_v18  ;;  %v296_v63 = vcombine.high %v280_v57, %v280_v57  ;;  %v297_v0 = vcombine.high %v287_v58, %v287_v58 }
 0x115   :  { %759 = vst.sshfl [vmem:[%s1162_s3 + $0x2f] sm:$0x1 pattern:$0x73625140] %v662_v42  ;;  %446 = vst [vmem:[%s1162_s3 + $0x3b] sm:$0x1] %v430_v52  ;;  %v529_v1 = vcombine.high %v521_v59, %v521_v59  ;;  %v537_v2 = vrot.slane %v521_v59, %v887_v18  ;;  %v298_v3 = vcombine.high %v294_v60, %v294_v60 }
 0x116   :  { %733 = vst.sshfl [vmem:[%s1162_s3 + $0x9] sm:$0x1 pattern:$0x73625140] %v265_v51  ;;  %706 = vst [vmem:[%s1162_s3 + $0x1f] sm:$0x1] %v693_v53  ;;  %v530_v4 = vcombine.high %v528_v62, %v528_v62  ;;  %v544_v5 = vrot.slane %v528_v62, %v887_v18 }
 0x117   :  { %735 = vst.sshfl [vmem:[%s1162_s3 + $0x29] sm:$0x1 pattern:$0x73625140] %v266_v54  ;;  %710 = vst [vmem:[%s1162_s3 + $0x3f] sm:$0x1] %v694_v56  ;;  %v551_v6 = vrot.slane %v529_v1, %v887_v18  ;;  %v559_v7 = vcombine.high %v537_v2, %v537_v2 }
 0x118   :  { %748 = vst.sshfl [vmem:[%s1162_s3 + $0x5] sm:$0x1 pattern:$0x73625140] %v521_v59  ;;  %309 = vst [vmem:[%s1162_s3 + $0x11] sm:$0x1] %v295_v61  ;;  %v558_v8 = vrot.slane %v530_v4, %v887_v18  ;;  %v560_v9 = vcombine.high %v544_v5, %v544_v5 }
 0x119   :  { %750 = vst.sshfl [vmem:[%s1162_s3 + $0x25] sm:$0x1 pattern:$0x73625140] %v528_v62  ;;  %310 = vst [vmem:[%s1162_s3 + $0x19] sm:$0x1] %v297_v0  ;;  %v561_v10 = vcombine.high %v551_v6, %v551_v6 }
 0x11a   :  { %313 = vst [vmem:[%s1162_s3 + $0x31] sm:$0x1] %v296_v63  ;;  %749 = vst.sshfl [vmem:[%s1162_s3 + $0xd] sm:$0x1 pattern:$0x73625140] %v529_v1  ;;  %v562_v11 = vcombine.high %v558_v8, %v558_v8 }
 0x11b   :  { %314 = vst [vmem:[%s1162_s3 + $0x39] sm:$0x1] %v298_v3  ;;  %751 = vst.sshfl [vmem:[%s1162_s3 + $0x2d] sm:$0x1 pattern:$0x73625140] %v530_v4 }
 0x11c   :  { %573 = vst [vmem:[%s1162_s3 + $0x15] sm:$0x1] %v559_v7  ;;  %577 = vst [vmem:[%s1162_s3 + $0x35] sm:$0x1] %v560_v9 }
 0x11d   :  { %574 = vst [vmem:[%s1162_s3 + $0x1d] sm:$0x1] %v561_v10  ;;  %578 = vst [vmem:[%s1162_s3 + $0x3d] sm:$0x1] %v562_v11 }

// kernel: sequence_generation_forward.3
= control target key start
LH: loop header
LB: loop body
LE: loop exit
PB: predicated region body
PF: predicated region fallthrough
CT: control target
= control target key end

     0   :  { %v544_v1 = vmov 0   ;;  %vm159_vm0 = vcmask 261120   ;;  %v419_v13 = vlaneseq  ;;  %s748_s1 = inlined_call_operand.vmem [shape: bf16[32,512], index: 1, kind: input, shape index: {}]   ;;  %s749_s0 = inlined_call_operand.vmem [shape: bf16[64,32], index: 0, kind: input, shape index: {}]   ;;  %s750_s2 = inlined_call_operand.vmem [shape: f32[1,512], index: 2, kind: input, shape index: {}]   ;;  %s751_s3 = inlined_call_operand.vmem [shape: f32[64,512], index: 3, kind: output, shape index: {}]  }
   0x1   :  { %v528_v0 = vld [vmem:[%s748_s1 + $0x4] ss:$16 sps:$4 sm:$0xff]   ;;  %204 = vmatprep.mubr.bf16.mxu0 %v544_v1  ;;  %277 = vmatprep.mubr.bf16.mxu1 %v544_v1  ;;  %v530_v2 = vld [vmem:[%s748_s1 + $0xc] ss:$16 sps:$4 sm:$0xff]   ;;  %v532_v3 = vld [vmem:[%s748_s1] ss:$16 sps:$4 sm:$0xff]  }
   0x2   :  { %172 = vmatprep.subr.bf16.mxu0 %v528_v0  ;;  %v533_v4 = vld [vmem:[%s748_s1 + $0x8] ss:$16 sps:$4 sm:$0xff]   ;;  %245 = vmatprep.subr.bf16.mxu1 %v530_v2  ;;  %v534_v5 = vld [vmem:[%s748_s1 + $0x24] ss:$16 sps:$4 sm:$0xff]   ;;  %v536_v6 = vld [vmem:[%s748_s1 + $0x2c] ss:$16 sps:$4 sm:$0xff]  }
   0x3   :  { %173 = vmatpush1.bf16.msra.mxu0 %v532_v3  ;;  %246 = vmatpush1.bf16.msra.mxu1 %v533_v4  ;;  %v538_v7 = vld [vmem:[%s748_s1 + $0x20] ss:$16 sps:$4 sm:$0xff]   ;;  %v539_v8 = vld [vmem:[%s748_s1 + $0x28] ss:$16 sps:$4 sm:$0xff]   ;;  %v420_v14 = vshrl.u32 %v419_v13, 7 }
   0x4   :  { %174 = vmatprep.subr.bf16.mxu0 %v534_v5  ;;  %247 = vmatprep.subr.bf16.mxu1 %v536_v6  ;;  %v540_v9 = vld [vmem:[%s749_s0] sm:$0xff]   ;;  %v541_v10 = vld [vmem:[%s749_s0 + $0x8] sm:$0xff]   ;;  %v542_v11 = vld [vmem:[%s749_s0 + $0x10] sm:$0xff]  }
   0x5   :  { %v543_v12 = vld [vmem:[%s749_s0 + $0x18] sm:$0xff]   ;;  %v421_v15 = vsub.s32 0, %v420_v14  ;;  %v429_v16 = vsub.s32 2, %v420_v14  ;;  %v417_v17 = vld [vmem:[%s750_s2] sm:$0xf]  ;;  %v425_v18 = vsub.s32 1, %v420_v14 }
   0x6   :  { %v433_v19 = vsub.s32 3, %v420_v14 }
   0x7   :  { %175 = vmatpush1.bf16.msra.mxu0 %v538_v7  ;;  %248 = vmatpush1.bf16.msra.mxu1 %v539_v8  ;;  %v612_v20 = vrot.slane %v417_v17, %v421_v15  ;;  %v614_v21 = vrot.slane %v417_v17, %v429_v16  ;;  %v616_v22 = vrot.slane %v417_v17, %v425_v18 }
   0x8   :  { %v618_v23 = vrot.slane %v417_v17, %v433_v19 }
   0xa   :  { %519 = vmatmul.mubr.msk.bf16.vlgmr.msra.gmra.mrb[0].mxu0 %vm159_vm0, %v540_v9  ;;  %523 = vmatmul.mubr.msk.bf16.vlgmr.msra.gmra.mrb[0].mxu1 %vm159_vm0, %v540_v9 }
   0xb   :  { %214 = vmatprep.mubr.bf16.mxu0 %v544_v1  ;;  %287 = vmatprep.mubr.bf16.mxu1 %v544_v1 }
  0x12   :  { %520 = vmatmul.mubr.msk.bf16.gmra.mrb[4].mxu0 %vm159_vm0, %v541_v10  ;;  %524 = vmatmul.mubr.msk.bf16.gmra.mrb[4].mxu1 %vm159_vm0, %v541_v10 }
  0x13   :  { %224 = vmatprep.mubr.bf16.mxu0 %v544_v1  ;;  %297 = vmatprep.mubr.bf16.mxu1 %v544_v1 }
  0x1a   :  { %521 = vmatmul.mubr.msk.bf16.gmra.mrb[8].mxu0 %vm159_vm0, %v542_v11  ;;  %525 = vmatmul.mubr.msk.bf16.gmra.mrb[8].mxu1 %vm159_vm0, %v542_v11 }
  0x1b   :  { %234 = vmatprep.mubr.bf16.mxu0 %v544_v1  ;;  %307 = vmatprep.mubr.bf16.mxu1 %v544_v1 }
  0x22   :  { %522 = vmatmul.mubr.msk.bf16.gmra.mrb[12].mxu0 %vm159_vm0, %v543_v12  ;;  %526 = vmatmul.mubr.msk.bf16.gmra.mrb[12].mxu1 %vm159_vm0, %v543_v12 }
  0xdd   :  { %v206_v24 = vpop.f32.mrb[0].mxu0  ;;  %v279_v25 = vpop.f32.mrb[0].mxu1 }
  0xde   :  { %v439_v26 = vadd.f32 %v612_v20, %v206_v24  ;;  %v441_v27 = vadd.f32 %v614_v21, %v279_v25  ;;  %v208_v28 = vpop.f32.mrb[1].mxu0  ;;  %v281_v29 = vpop.f32.mrb[1].mxu1 }
  0xdf   :  { %v440_v30 = vadd.f32 %v616_v22, %v208_v28  ;;  %v442_v31 = vadd.f32 %v618_v23, %v281_v29  ;;  %v210_v32 = vpop.f32.mrb[2].mxu0  ;;  %v283_v33 = vpop.f32.mrb[2].mxu1 }
  0xe0   :  { %471 = vst [vmem:[%s751_s3] sm:$0xff] %v439_v26  ;;  %473 = vst [vmem:[%s751_s3 + $0x10] sm:$0xff] %v441_v27  ;;  %v443_v34 = vadd.f32 %v612_v20, %v210_v32  ;;  %v445_v35 = vadd.f32 %v614_v21, %v283_v33  ;;  %v212_v36 = vpop.f32.mrb[3].mxu0  ;;  %v285_v37 = vpop.f32.mrb[3].mxu1 }
  0xe1   :  { %472 = vst [vmem:[%s751_s3 + $0x8] sm:$0xff] %v440_v30  ;;  %474 = vst [vmem:[%s751_s3 + $0x18] sm:$0xff] %v442_v31  ;;  %v444_v38 = vadd.f32 %v616_v22, %v212_v36  ;;  %v446_v39 = vadd.f32 %v618_v23, %v285_v37 }
  0xe2   :  { %475 = vst [vmem:[%s751_s3 + $0x20] sm:$0xff] %v443_v34  ;;  %477 = vst [vmem:[%s751_s3 + $0x30] sm:$0xff] %v445_v35 }
  0xe3   :  { %476 = vst [vmem:[%s751_s3 + $0x28] sm:$0xff] %v444_v38  ;;  %478 = vst [vmem:[%s751_s3 + $0x38] sm:$0xff] %v446_v39 }
  0xe5   :  { %v216_v40 = vpop.f32.mrb[4].mxu0  ;;  %v289_v41 = vpop.f32.mrb[4].mxu1 }
  0xe6   :  { %v447_v42 = vadd.f32 %v612_v20, %v216_v40  ;;  %v449_v43 = vadd.f32 %v614_v21, %v289_v41  ;;  %v218_v44 = vpop.f32.mrb[5].mxu0  ;;  %v291_v45 = vpop.f32.mrb[5].mxu1 }
  0xe7   :  { %v448_v46 = vadd.f32 %v616_v22, %v218_v44  ;;  %v450_v47 = vadd.f32 %v618_v23, %v291_v45  ;;  %v220_v48 = vpop.f32.mrb[6].mxu0  ;;  %v293_v49 = vpop.f32.mrb[6].mxu1 }
  0xe8   :  { %479 = vst [vmem:[%s751_s3 + $0x40] sm:$0xff] %v447_v42  ;;  %481 = vst [vmem:[%s751_s3 + $0x50] sm:$0xff] %v449_v43  ;;  %v451_v50 = vadd.f32 %v612_v20, %v220_v48  ;;  %v453_v51 = vadd.f32 %v614_v21, %v293_v49  ;;  %v222_v52 = vpop.f32.mrb[7].mxu0  ;;  %v295_v53 = vpop.f32.mrb[7].mxu1 }
  0xe9   :  { %480 = vst [vmem:[%s751_s3 + $0x48] sm:$0xff] %v448_v46  ;;  %482 = vst [vmem:[%s751_s3 + $0x58] sm:$0xff] %v450_v47  ;;  %v452_v54 = vadd.f32 %v616_v22, %v222_v52  ;;  %v454_v55 = vadd.f32 %v618_v23, %v295_v53 }
  0xea   :  { %483 = vst [vmem:[%s751_s3 + $0x60] sm:$0xff] %v451_v50  ;;  %485 = vst [vmem:[%s751_s3 + $0x70] sm:$0xff] %v453_v51 }
  0xeb   :  { %484 = vst [vmem:[%s751_s3 + $0x68] sm:$0xff] %v452_v54  ;;  %486 = vst [vmem:[%s751_s3 + $0x78] sm:$0xff] %v454_v55 }
  0xed   :  { %v226_v56 = vpop.f32.mrb[8].mxu0  ;;  %v299_v57 = vpop.f32.mrb[8].mxu1 }
  0xee   :  { %v455_v58 = vadd.f32 %v612_v20, %v226_v56  ;;  %v457_v59 = vadd.f32 %v614_v21, %v299_v57  ;;  %v228_v60 = vpop.f32.mrb[9].mxu0  ;;  %v301_v61 = vpop.f32.mrb[9].mxu1 }
  0xef   :  { %v456_v62 = vadd.f32 %v616_v22, %v228_v60  ;;  %v458_v63 = vadd.f32 %v618_v23, %v301_v61  ;;  %v230_v0 = vpop.f32.mrb[10].mxu0  ;;  %v303_v1 = vpop.f32.mrb[10].mxu1 }
  0xf0   :  { %487 = vst [vmem:[%s751_s3 + $0x80] sm:$0xff] %v455_v58  ;;  %489 = vst [vmem:[%s751_s3 + $0x90] sm:$0xff] %v457_v59  ;;  %v459_v2 = vadd.f32 %v612_v20, %v230_v0  ;;  %v461_v3 = vadd.f32 %v614_v21, %v303_v1  ;;  %v232_v4 = vpop.f32.mrb[11].mxu0  ;;  %v305_v5 = vpop.f32.mrb[11].mxu1 }
  0xf1   :  { %488 = vst [vmem:[%s751_s3 + $0x88] sm:$0xff] %v456_v62  ;;  %490 = vst [vmem:[%s751_s3 + $0x98] sm:$0xff] %v458_v63  ;;  %v460_v6 = vadd.f32 %v616_v22, %v232_v4  ;;  %v462_v7 = vadd.f32 %v618_v23, %v305_v5 }
  0xf2   :  { %491 = vst [vmem:[%s751_s3 + $0xa0] sm:$0xff] %v459_v2  ;;  %493 = vst [vmem:[%s751_s3 + $0xb0] sm:$0xff] %v461_v3 }
  0xf3   :  { %492 = vst [vmem:[%s751_s3 + $0xa8] sm:$0xff] %v460_v6  ;;  %494 = vst [vmem:[%s751_s3 + $0xb8] sm:$0xff] %v462_v7 }
  0xf5   :  { %v236_v8 = vpop.f32.mrb[12].mxu0  ;;  %v309_v9 = vpop.f32.mrb[12].mxu1 }
  0xf6   :  { %v463_v10 = vadd.f32 %v612_v20, %v236_v8  ;;  %v465_v11 = vadd.f32 %v614_v21, %v309_v9  ;;  %v238_v12 = vpop.f32.mrb[13].mxu0  ;;  %v311_v13 = vpop.f32.mrb[13].mxu1 }
  0xf7   :  { %v464_v14 = vadd.f32 %v616_v22, %v238_v12  ;;  %v466_v15 = vadd.f32 %v618_v23, %v311_v13  ;;  %v240_v16 = vpop.f32.mrb[14].mxu0  ;;  %v313_v17 = vpop.f32.mrb[14].mxu1 }
  0xf8   :  { %495 = vst [vmem:[%s751_s3 + $0xc0] sm:$0xff] %v463_v10  ;;  %497 = vst [vmem:[%s751_s3 + $0xd0] sm:$0xff] %v465_v11  ;;  %v467_v18 = vadd.f32 %v612_v20, %v240_v16  ;;  %v469_v19 = vadd.f32 %v614_v21, %v313_v17  ;;  %v242_v24 = vpop.f32.mrb[15].mxu0  ;;  %v315_v25 = vpop.f32.mrb[15].mxu1 }
  0xf9   :  { %496 = vst [vmem:[%s751_s3 + $0xc8] sm:$0xff] %v464_v14  ;;  %498 = vst [vmem:[%s751_s3 + $0xd8] sm:$0xff] %v466_v15  ;;  %v468_v26 = vadd.f32 %v616_v22, %v242_v24  ;;  %v470_v27 = vadd.f32 %v618_v23, %v315_v25 }
  0xfa   :  { %499 = vst [vmem:[%s751_s3 + $0xe0] sm:$0xff] %v467_v18  ;;  %501 = vst [vmem:[%s751_s3 + $0xf0] sm:$0xff] %v469_v19 }
  0xfb   :  { %500 = vst [vmem:[%s751_s3 + $0xe8] sm:$0xff] %v468_v26  ;;  %502 = vst [vmem:[%s751_s3 + $0xf8] sm:$0xff] %v470_v27 }

// kernel: sequence_generation_forward.4
= control target key start
LH: loop header
LB: loop body
LE: loop exit
PB: predicated region body
PF: predicated region fallthrough
CT: control target
= control target key end

     0   :  { %v1515_v1 = vmov 0   ;;  %v1516_v33 = vmov 0.0|0.0   ;;  %s2188_s1 = inlined_call_operand.vmem [shape: bf16[128,512], index: 1, kind: input, shape index: {}]   ;;  %s2189_s0 = inlined_call_operand.vmem [shape: f32[8,8,512], index: 0, kind: input, shape index: {}]   ;;  %s2190_s2 = inlined_call_operand.vmem [shape: bf16[8,8,128], index: 2, kind: output, shape index: {0}]   ;;  %s2191_s4 = inlined_call_operand.vmem [shape: f32[8,128], index: 4, kind: output, shape index: {2}]   ;;  %s2192_s3 = inlined_call_operand.vmem [shape: f32[8,128], index: 3, kind: output, shape index: {1}]  }
   0x1   :  { %v1545_v0 = vld [vmem:[%s2188_s1 + $0x4] ss:$16 sps:$4 sm:$0xff]   ;;  %252 = vmatprep.mubr.bf16.mxu0 %v1515_v1  ;;  %293 = vmatprep.mubr.bf16.mxu1 %v1515_v1  ;;  %v1552_v2 = vld [vmem:[%s2188_s1] ss:$16 sps:$4 sm:$0xff]   ;;  %v1575_v6 = vld [vmem:[%s2188_s1 + $0xc] ss:$16 sps:$4 sm:$0xff]  }
   0x2   :  { %220 = vmatprep.subr.bf16.mxu0 %v1545_v0  ;;  %v1558_v3 = vld [vmem:[%s2188_s1 + $0x24] ss:$16 sps:$4 sm:$0xff]   ;;  %v1564_v4 = vld [vmem:[%s2188_s1 + $0x20] ss:$16 sps:$4 sm:$0xff]   ;;  %v1580_v7 = vld [vmem:[%s2188_s1 + $0x8] ss:$16 sps:$4 sm:$0xff]   ;;  %261 = vmatprep.subr.bf16.mxu1 %v1575_v6 }
   0x3   :  { %221 = vmatpush1.bf16.msra.mxu0 %v1552_v2  ;;  %v1570_v5 = vld [vmem:[%s2188_s1 + $0x44] ss:$16 sps:$4 sm:$0xff]   ;;  %v1586_v8 = vld [vmem:[%s2188_s1 + $0x40] ss:$16 sps:$4 sm:$0xff]   ;;  %262 = vmatpush1.bf16.msra.mxu1 %v1580_v7  ;;  %v1599_v10 = vld [vmem:[%s2188_s1 + $0x2c] ss:$16 sps:$4 sm:$0xff]  }
   0x4   :  { %222 = vmatprep.subr.bf16.mxu0 %v1558_v3  ;;  %v1593_v9 = vld [vmem:[%s2188_s1 + $0x64] ss:$16 sps:$4 sm:$0xff]   ;;  %v1604_v11 = vld [vmem:[%s2188_s1 + $0x28] ss:$16 sps:$4 sm:$0xff]   ;;  %263 = vmatprep.subr.bf16.mxu1 %v1599_v10  ;;  %v1611_v12 = vld [vmem:[%s2188_s1 + $0x60] ss:$16 sps:$4 sm:$0xff]  }
   0x5   :  { %v1616_v13 = vld [vmem:[%s2188_s1 + $0x84] ss:$16 sps:$4 sm:$0xff]   ;;  %v1621_v14 = vld [vmem:[%s2188_s1 + $0x4c] ss:$16 sps:$4 sm:$0xff]   ;;  %v1628_v15 = vld [vmem:[%s2188_s1 + $0x48] ss:$16 sps:$4 sm:$0xff]  }
   0x6   :  { %v1634_v16 = vld [vmem:[%s2188_s1 + $0x6c] ss:$16 sps:$4 sm:$0xff]   ;;  %v1640_v17 = vld [vmem:[%s2188_s1 + $0x80] ss:$16 sps:$4 sm:$0xff]   ;;  %v1646_v18 = vld [vmem:[%s2188_s1 + $0xa4] ss:$16 sps:$4 sm:$0xff]  }
   0x7   :  { %223 = vmatpush1.bf16.msra.mxu0 %v1564_v4  ;;  %264 = vmatpush1.bf16.msra.mxu1 %v1604_v11  ;;  %v1652_v19 = vld [vmem:[%s2188_s1 + $0x68] ss:$16 sps:$4 sm:$0xff]   ;;  %v1658_v20 = vld [vmem:[%s2188_s1 + $0x8c] ss:$16 sps:$4 sm:$0xff]   ;;  %v1664_v21 = vld [vmem:[%s2188_s1 + $0xa0] ss:$16 sps:$4 sm:$0xff]  }
   0x8   :  { %224 = vmatprep.subr.bf16.mxu0 %v1570_v5  ;;  %265 = vmatprep.subr.bf16.mxu1 %v1621_v14  ;;  %v1669_v22 = vld [vmem:[%s2188_s1 + $0xc4] ss:$16 sps:$4 sm:$0xff]   ;;  %v1676_v23 = vld [vmem:[%s2188_s1 + $0x88] ss:$16 sps:$4 sm:$0xff]   ;;  %v1682_v24 = vld [vmem:[%s2188_s1 + $0xac] ss:$16 sps:$4 sm:$0xff]  }
   0x9   :  { %v1688_v25 = vld [vmem:[%s2188_s1 + $0xc0] ss:$16 sps:$4 sm:$0xff]   ;;  %v1694_v26 = vld [vmem:[%s2188_s1 + $0xe4] ss:$16 sps:$4 sm:$0xff]   ;;  %v1700_v27 = vld [vmem:[%s2188_s1 + $0xa8] ss:$16 sps:$4 sm:$0xff]  }
   0xa   :  { %v1706_v28 = vld [vmem:[%s2188_s1 + $0xcc] ss:$16 sps:$4 sm:$0xff]   ;;  %v1712_v29 = vld [vmem:[%s2188_s1 + $0xe0] ss:$16 sps:$4 sm:$0xff]   ;;  %v1719_v30 = vld [vmem:[%s2188_s1 + $0xc8] ss:$16 sps:$4 sm:$0xff]  }
   0xb   :  { %225 = vmatpush1.bf16.msra.mxu0 %v1586_v8  ;;  %266 = vmatpush1.bf16.msra.mxu1 %v1628_v15  ;;  %v1725_v31 = vld [vmem:[%s2188_s1 + $0xec] ss:$16 sps:$4 sm:$0xff]   ;;  %v1732_v32 = vld [vmem:[%s2188_s1 + $0xe8] ss:$16 sps:$4 sm:$0xff]   ;;  %v55_v34 = vld [vmem:[%s2189_s0] sm:$0xff] }
   0xc   :  { %226 = vmatprep.subr.bf16.mxu0 %v1593_v9  ;;  %267 = vmatprep.subr.bf16.mxu1 %v1634_v16  ;;  %v56_v35 = vld [vmem:[%s2189_s0 + $0x8] sm:$0xff]  ;;  %v58_v44 = vld [vmem:[%s2189_s0 + $0x18] sm:$0xff]  ;;  %v57_v50 = vld [vmem:[%s2189_s0 + $0x10] sm:$0xff] }
   0xf   :  { %227 = vmatpush1.bf16.msra.mxu0 %v1611_v12  ;;  %268 = vmatpush1.bf16.msra.mxu1 %v1652_v19 }
  0x10   :  { %228 = vmatprep.subr.bf16.mxu0 %v1616_v13  ;;  %269 = vmatprep.subr.bf16.mxu1 %v1658_v20 }
  0x13   :  { %229 = vmatpush1.bf16.msra.mxu0 %v1640_v17  ;;  %270 = vmatpush1.bf16.msra.mxu1 %v1676_v23 }
  0x14   :  { %230 = vmatprep.subr.bf16.mxu0 %v1646_v18  ;;  %271 = vmatprep.subr.bf16.mxu1 %v1682_v24 }
  0x17   :  { %231 = vmatpush1.bf16.msra.mxu0 %v1664_v21  ;;  %272 = vmatpush1.bf16.msra.mxu1 %v1700_v27 }
  0x18   :  { %232 = vmatprep.subr.bf16.mxu0 %v1669_v22  ;;  %273 = vmatprep.subr.bf16.mxu1 %v1706_v28 }
  0x1b   :  { %233 = vmatpush1.bf16.msra.mxu0 %v1688_v25  ;;  %274 = vmatpush1.bf16.msra.mxu1 %v1719_v30 }
  0x1c   :  { %234 = vmatprep.subr.bf16.mxu0 %v1694_v26  ;;  %275 = vmatprep.subr.bf16.mxu1 %v1725_v31 }
  0x1f   :  { %235 = vmatpush1.bf16.msra.mxu0 %v1712_v29  ;;  %276 = vmatpush1.bf16.msra.mxu1 %v1732_v32 }
  0x20   :  { %342 = vmatprep.subr.bf16.mxu0 %v1545_v0  ;;  %383 = vmatprep.subr.bf16.mxu1 %v1575_v6 }
  0x22   :  { %253 = vmatmul.mubr.bf16.vlgmr.msra.gmra.mrb[0].mxu0 %v1516_v33  ;;  %294 = vmatmul.mubr.bf16.vlgmr.msra.gmra.mrb[0].mxu1 %v1516_v33 }
  0x23   :  { %343 = vmatpush1.bf16.msra.mxu0 %v1552_v2  ;;  %374 = vmatprep.mubr.bf16.mxu0 %v1515_v1 }
  0x24   :  { %344 = vmatprep.subr.bf16.mxu0 %v1558_v3  ;;  %384 = vmatpush1.bf16.msra.mxu1 %v1580_v7 }
  0x25   :  { %385 = vmatprep.subr.bf16.mxu1 %v1599_v10  ;;  %415 = vmatprep.mubr.bf16.mxu1 %v1515_v1 }
  0x27   :  { %345 = vmatpush1.bf16.msra.mxu0 %v1564_v4 }
  0x28   :  { %346 = vmatprep.subr.bf16.mxu0 %v1570_v5  ;;  %386 = vmatpush1.bf16.msra.mxu1 %v1604_v11 }
  0x29   :  { %387 = vmatprep.subr.bf16.mxu1 %v1621_v14 }
  0x2b   :  { %347 = vmatpush1.bf16.msra.mxu0 %v1586_v8 }
  0x2c   :  { %348 = vmatprep.subr.bf16.mxu0 %v1593_v9  ;;  %388 = vmatpush1.bf16.msra.mxu1 %v1628_v15 }
  0x2d   :  { %389 = vmatprep.subr.bf16.mxu1 %v1634_v16 }
  0x2f   :  { %349 = vmatpush1.bf16.msra.mxu0 %v1611_v12 }
  0x30   :  { %350 = vmatprep.subr.bf16.mxu0 %v1616_v13  ;;  %390 = vmatpush1.bf16.msra.mxu1 %v1652_v19 }
  0x31   :  { %391 = vmatprep.subr.bf16.mxu1 %v1658_v20 }
  0x33   :  { %351 = vmatpush1.bf16.msra.mxu0 %v1640_v17 }
  0x34   :  { %352 = vmatprep.subr.bf16.mxu0 %v1646_v18  ;;  %392 = vmatpush1.bf16.msra.mxu1 %v1676_v23 }
  0x35   :  { %393 = vmatprep.subr.bf16.mxu1 %v1682_v24 }
  0x37   :  { %353 = vmatpush1.bf16.msra.mxu0 %v1664_v21 }
  0x38   :  { %354 = vmatprep.subr.bf16.mxu0 %v1669_v22  ;;  %394 = vmatpush1.bf16.msra.mxu1 %v1700_v27 }
  0x39   :  { %395 = vmatprep.subr.bf16.mxu1 %v1706_v28 }
  0x3b   :  { %355 = vmatpush1.bf16.msra.mxu0 %v1688_v25 }
  0x3c   :  { %356 = vmatprep.subr.bf16.mxu0 %v1694_v26  ;;  %396 = vmatpush1.bf16.msra.mxu1 %v1719_v30 }
  0x3d   :  { %397 = vmatprep.subr.bf16.mxu1 %v1725_v31 }
  0x3f   :  { %357 = vmatpush1.bf16.msra.mxu0 %v1712_v29 }
  0x40   :  { %465 = vmatprep.subr.bf16.mxu0 %v1545_v0  ;;  %398 = vmatpush1.bf16.msra.mxu1 %v1732_v32 }
  0x41   :  { %506 = vmatprep.subr.bf16.mxu1 %v1575_v6 }
  0xf5   :  { %v254_v36 = vpop.f32.mrb[0].mxu0  ;;  %v295_v45 = vpop.f32.mrb[0].mxu1 }
  0xf6   :  { %v302_v37 = vadd.f32 %v254_v36, %v55_v34  ;;  %v256_v38 = vpop.f32.mrb[1].mxu0  ;;  %v297_v46 = vpop.f32.mrb[1].mxu1  ;;  %v304_v52 = vadd.f32 %v295_v45, %v57_v50 }
  0xf7   :  { %v303_v39 = vadd.f32 %v256_v38, %v56_v35  ;;  %v258_v40 = vpop.f32.mrb[2].mxu0  ;;  %v305_v47 = vadd.f32 %v297_v46, %v58_v44  ;;  %v299_v48 = vpop.f32.mrb[2].mxu1  ;;  %v1249_v38 = vld [vmem:[%s2189_s0 + $0x20] sm:$0xff] }
  0xf8   :  { %v1246_v41 = vmul.f32 -1.442695, %v302_v37  ;;  %v259_v42 = vpop.f32.mrb[3].mxu0  ;;  %v300_v49 = vpop.f32.mrb[3].mxu1 }
  0xf9   :  { %v1247_v43 = vmul.f32 -1.442695, %v303_v39  ;;  %v1248_v51 = vmul.f32 -1.442695, %v305_v47  ;;  %v1250_v39 = vld [vmem:[%s2189_s0 + $0x28] sm:$0xff] }
  0xfa   :  { %1355 = vpow2.f32 %v1246_v41 }
  0xfb   :  { %1357 = vpow2.f32 %v1247_v43 }
  0xfc   :  { %1359 = vpow2.f32 %v1248_v51 }
  0xfd   :  { %1361 = vtanh.f32 %v304_v52  ;;  %v1252_v52 = vld [vmem:[%s2189_s0 + $0x38] sm:$0xff] }
 0x104   :  { %v1356_v53 = vpop.eup %1355 }
 0x105   :  { %v1358_v54 = vpop.eup %1357  ;;  %v309_v55 = vadd.f32 1.0, %v1356_v53 }
 0x106   :  { %v315_v56 = vadd.f32 1.0, %v1358_v54  ;;  %v1360_v57 = vpop.eup %1359  ;;  %v1251_v54 = vld [vmem:[%s2189_s0 + $0x30] sm:$0xff] }
 0x107   :  { %1363 = vrcp.f32 %v309_v55  ;;  %v1362_v58 = vpop.eup %1361  ;;  %v322_v60 = vadd.f32 1.0, %v1360_v57 }
 0x108   :  { %1365 = vrcp.f32 %v315_v56 }
 0x109   :  { %1367 = vrcp.f32 %v322_v60 }
 0x111   :  { %v1364_v59 = vpop.eup %1363 }
 0x112   :  { %v1366_v61 = vpop.eup %1365  ;;  %v326_v62 = vmul.f32 %v1364_v59, %v1362_v58 }
 0x113   :  { %v325_v63 = vmul.f32 0.0, %v1366_v61  ;;  %v1368_v34 = vpop.eup %1367 }
 0x115   :  { %v1784_v33 = vadd.f32 %v326_v62, %v325_v63 }
 0x117   :  { %1369 = vtanh.f32 %v1784_v33 }
 0x121   :  { %v1370_v35 = vpop.eup %1369 }
 0x122   :  { %v329_v36 = vmul.f32 %v1370_v35, %v1368_v34 }
 0x124   :  { %v330_v37 = vpack.c.bf16 %v329_v36, %v329_v36 }
 0x126   :  { %331 = vst [vmem:[%s2190_s2] sm:$0xf] %v330_v37  ;;  %375 = vmatmul.mubr.bf16.vlgmr.msra.gmra.mrb[4].mxu0 %v330_v37  ;;  %416 = vmatmul.mubr.bf16.vlgmr.msra.gmra.mrb[4].mxu1 %v330_v37 }
 0x127   :  { %466 = vmatpush1.bf16.msra.mxu0 %v1552_v2  ;;  %507 = vmatpush1.bf16.msra.mxu1 %v1580_v7 }
 0x128   :  { %467 = vmatprep.subr.bf16.mxu0 %v1558_v3  ;;  %508 = vmatprep.subr.bf16.mxu1 %v1599_v10 }
 0x129   :  { %497 = vmatprep.mubr.bf16.mxu0 %v1515_v1  ;;  %538 = vmatprep.mubr.bf16.mxu1 %v1515_v1 }
 0x12b   :  { %468 = vmatpush1.bf16.msra.mxu0 %v1564_v4  ;;  %509 = vmatpush1.bf16.msra.mxu1 %v1604_v11 }
 0x12c   :  { %469 = vmatprep.subr.bf16.mxu0 %v1570_v5  ;;  %510 = vmatprep.subr.bf16.mxu1 %v1621_v14 }
 0x12f   :  { %470 = vmatpush1.bf16.msra.mxu0 %v1586_v8  ;;  %511 = vmatpush1.bf16.msra.mxu1 %v1628_v15 }
 0x130   :  { %471 = vmatprep.subr.bf16.mxu0 %v1593_v9  ;;  %512 = vmatprep.subr.bf16.mxu1 %v1634_v16 }
 0x133   :  { %472 = vmatpush1.bf16.msra.mxu0 %v1611_v12  ;;  %513 = vmatpush1.bf16.msra.mxu1 %v1652_v19 }
 0x134   :  { %473 = vmatprep.subr.bf16.mxu0 %v1616_v13  ;;  %514 = vmatprep.subr.bf16.mxu1 %v1658_v20 }
 0x137   :  { %474 = vmatpush1.bf16.msra.mxu0 %v1640_v17  ;;  %515 = vmatpush1.bf16.msra.mxu1 %v1676_v23 }
 0x138   :  { %475 = vmatprep.subr.bf16.mxu0 %v1646_v18  ;;  %516 = vmatprep.subr.bf16.mxu1 %v1682_v24 }
 0x13b   :  { %476 = vmatpush1.bf16.msra.mxu0 %v1664_v21  ;;  %517 = vmatpush1.bf16.msra.mxu1 %v1700_v27 }
 0x13c   :  { %477 = vmatprep.subr.bf16.mxu0 %v1669_v22  ;;  %518 = vmatprep.subr.bf16.mxu1 %v1706_v28 }
 0x13f   :  { %478 = vmatpush1.bf16.msra.mxu0 %v1688_v25  ;;  %519 = vmatpush1.bf16.msra.mxu1 %v1719_v30 }
 0x140   :  { %479 = vmatprep.subr.bf16.mxu0 %v1694_v26  ;;  %520 = vmatprep.subr.bf16.mxu1 %v1725_v31 }
 0x143   :  { %480 = vmatpush1.bf16.msra.mxu0 %v1712_v29  ;;  %521 = vmatpush1.bf16.msra.mxu1 %v1732_v32 }
 0x144   :  { %588 = vmatprep.subr.bf16.mxu0 %v1545_v0  ;;  %629 = vmatprep.subr.bf16.mxu1 %v1575_v6 }
 0x1f9   :  { %v376_v40 = vpop.f32.mrb[4].mxu0  ;;  %v417_v41 = vpop.f32.mrb[4].mxu1 }
 0x1fa   :  { %v424_v42 = vadd.f32 %v1249_v38, %v376_v40  ;;  %v378_v43 = vpop.f32.mrb[5].mxu0  ;;  %v419_v44 = vpop.f32.mrb[5].mxu1  ;;  %v426_v56 = vadd.f32 %v1251_v54, %v417_v41 }
 0x1fb   :  { %v425_v45 = vadd.f32 %v1250_v39, %v378_v43  ;;  %v380_v46 = vpop.f32.mrb[6].mxu0  ;;  %v421_v47 = vpop.f32.mrb[6].mxu1  ;;  %v427_v53 = vadd.f32 %v1252_v52, %v419_v44  ;;  %v1258_v43 = vld [vmem:[%s2189_s0 + $0x48] sm:$0xff] }
 0x1fc   :  { %v1253_v48 = vmul.f32 -1.442695, %v424_v42  ;;  %v381_v49 = vpop.f32.mrb[7].mxu0  ;;  %v422_v50 = vpop.f32.mrb[7].mxu1 }
 0x1fd   :  { %v1254_v51 = vmul.f32 -1.442695, %v425_v45  ;;  %v1255_v55 = vmul.f32 -1.442695, %v427_v53 }
 0x1fe   :  { %1371 = vpow2.f32 %v1253_v48 }
 0x1ff   :  { %1373 = vpow2.f32 %v1254_v51 }
 0x200   :  { %1375 = vpow2.f32 %v1255_v55 }
 0x201   :  { %1377 = vtanh.f32 %v426_v56  ;;  %v1260_v56 = vld [vmem:[%s2189_s0 + $0x58] sm:$0xff] }
 0x208   :  { %v1372_v57 = vpop.eup %1371 }
 0x209   :  { %v1374_v58 = vpop.eup %1373  ;;  %v431_v59 = vadd.f32 1.0, %v1372_v57 }
 0x20a   :  { %v437_v60 = vadd.f32 1.0, %v1374_v58  ;;  %v1376_v61 = vpop.eup %1375  ;;  %v1259_v58 = vld [vmem:[%s2189_s0 + $0x50] sm:$0xff] }
 0x20b   :  { %1379 = vrcp.f32 %v431_v59  ;;  %v1378_v62 = vpop.eup %1377  ;;  %v444_v36 = vadd.f32 1.0, %v1376_v61 }
 0x20c   :  { %1381 = vrcp.f32 %v437_v60 }
 0x20d   :  { %1383 = vrcp.f32 %v444_v36 }
 0x215   :  { %v1380_v63 = vpop.eup %1379 }
 0x216   :  { %v1382_v34 = vpop.eup %1381  ;;  %v448_v35 = vmul.f32 %v1380_v63, %v1378_v62 }
 0x217   :  { %v447_v37 = vmul.f32 %v1382_v34, %v1784_v33  ;;  %v1384_v39 = vpop.eup %1383  ;;  %v1257_v33 = vld [vmem:[%s2189_s0 + $0x40] sm:$0xff] }
 0x219   :  { %v1837_v38 = vadd.f32 %v448_v35, %v447_v37 }
 0x21b   :  { %1385 = vtanh.f32 %v1837_v38 }
 0x225   :  { %v1386_v40 = vpop.eup %1385 }
 0x226   :  { %v451_v41 = vmul.f32 %v1386_v40, %v1384_v39 }
 0x228   :  { %v452_v42 = vpack.c.bf16 %v451_v41, %v451_v41 }
 0x22a   :  { %1256 = vst [vmem:[%s2190_s2 + $0x4] sm:$0xf] %v452_v42  ;;  %498 = vmatmul.mubr.bf16.vlgmr.msra.gmra.mrb[8].mxu0 %v452_v42  ;;  %539 = vmatmul.mubr.bf16.vlgmr.msra.gmra.mrb[8].mxu1 %v452_v42 }
 0x22b   :  { %589 = vmatpush1.bf16.msra.mxu0 %v1552_v2  ;;  %630 = vmatpush1.bf16.msra.mxu1 %v1580_v7 }
 0x22c   :  { %590 = vmatprep.subr.bf16.mxu0 %v1558_v3  ;;  %631 = vmatprep.subr.bf16.mxu1 %v1599_v10 }
 0x22d   :  { %620 = vmatprep.mubr.bf16.mxu0 %v1515_v1  ;;  %661 = vmatprep.mubr.bf16.mxu1 %v1515_v1 }
 0x22f   :  { %591 = vmatpush1.bf16.msra.mxu0 %v1564_v4  ;;  %632 = vmatpush1.bf16.msra.mxu1 %v1604_v11 }
 0x230   :  { %592 = vmatprep.subr.bf16.mxu0 %v1570_v5  ;;  %633 = vmatprep.subr.bf16.mxu1 %v1621_v14 }
 0x233   :  { %593 = vmatpush1.bf16.msra.mxu0 %v1586_v8  ;;  %634 = vmatpush1.bf16.msra.mxu1 %v1628_v15 }
 0x234   :  { %594 = vmatprep.subr.bf16.mxu0 %v1593_v9  ;;  %635 = vmatprep.subr.bf16.mxu1 %v1634_v16 }
 0x237   :  { %595 = vmatpush1.bf16.msra.mxu0 %v1611_v12  ;;  %636 = vmatpush1.bf16.msra.mxu1 %v1652_v19 }
 0x238   :  { %596 = vmatprep.subr.bf16.mxu0 %v1616_v13  ;;  %637 = vmatprep.subr.bf16.mxu1 %v1658_v20 }
 0x23b   :  { %597 = vmatpush1.bf16.msra.mxu0 %v1640_v17  ;;  %638 = vmatpush1.bf16.msra.mxu1 %v1676_v23 }
 0x23c   :  { %598 = vmatprep.subr.bf16.mxu0 %v1646_v18  ;;  %639 = vmatprep.subr.bf16.mxu1 %v1682_v24 }
 0x23f   :  { %599 = vmatpush1.bf16.msra.mxu0 %v1664_v21  ;;  %640 = vmatpush1.bf16.msra.mxu1 %v1700_v27 }
 0x240   :  { %600 = vmatprep.subr.bf16.mxu0 %v1669_v22  ;;  %641 = vmatprep.subr.bf16.mxu1 %v1706_v28 }
 0x243   :  { %601 = vmatpush1.bf16.msra.mxu0 %v1688_v25  ;;  %642 = vmatpush1.bf16.msra.mxu1 %v1719_v30 }
 0x244   :  { %602 = vmatprep.subr.bf16.mxu0 %v1694_v26  ;;  %643 = vmatprep.subr.bf16.mxu1 %v1725_v31 }
 0x247   :  { %603 = vmatpush1.bf16.msra.mxu0 %v1712_v29  ;;  %644 = vmatpush1.bf16.msra.mxu1 %v1732_v32 }
 0x248   :  { %711 = vmatprep.subr.bf16.mxu0 %v1545_v0  ;;  %752 = vmatprep.subr.bf16.mxu1 %v1575_v6 }
 0x2fd   :  { %v499_v44 = vpop.f32.mrb[8].mxu0  ;;  %v540_v45 = vpop.f32.mrb[8].mxu1 }
 0x2fe   :  { %v547_v46 = vadd.f32 %v1257_v33, %v499_v44  ;;  %v501_v47 = vpop.f32.mrb[9].mxu0  ;;  %v542_v48 = vpop.f32.mrb[9].mxu1  ;;  %v549_v60 = vadd.f32 %v1259_v58, %v540_v45 }
 0x2ff   :  { %v548_v49 = vadd.f32 %v1258_v43, %v501_v47  ;;  %v503_v50 = vpop.f32.mrb[10].mxu0  ;;  %v544_v51 = vpop.f32.mrb[10].mxu1  ;;  %v550_v57 = vadd.f32 %v1260_v56, %v542_v48  ;;  %v1266_v47 = vld [vmem:[%s2189_s0 + $0x68] sm:$0xff] }
 0x300   :  { %v1261_v52 = vmul.f32 -1.442695, %v547_v46  ;;  %v504_v53 = vpop.f32.mrb[11].mxu0  ;;  %v545_v54 = vpop.f32.mrb[11].mxu1 }
 0x301   :  { %v1262_v55 = vmul.f32 -1.442695, %v548_v49  ;;  %v1263_v59 = vmul.f32 -1.442695, %v550_v57 }
 0x302   :  { %1387 = vpow2.f32 %v1261_v52 }
 0x303   :  { %1389 = vpow2.f32 %v1262_v55 }
 0x304   :  { %1391 = vpow2.f32 %v1263_v59 }
 0x305   :  { %1393 = vtanh.f32 %v549_v60  ;;  %v1268_v60 = vld [vmem:[%s2189_s0 + $0x78] sm:$0xff] }
 0x30c   :  { %v1388_v61 = vpop.eup %1387 }
 0x30d   :  { %v1390_v62 = vpop.eup %1389  ;;  %v554_v63 = vadd.f32 1.0, %v1388_v61 }
 0x30e   :  { %v560_v34 = vadd.f32 1.0, %v1390_v62  ;;  %v1392_v35 = vpop.eup %1391  ;;  %v1267_v62 = vld [vmem:[%s2189_s0 + $0x70] sm:$0xff] }
 0x30f   :  { %1395 = vrcp.f32 %v554_v63  ;;  %v1394_v36 = vpop.eup %1393  ;;  %v567_v41 = vadd.f32 1.0, %v1392_v35 }
 0x310   :  { %1397 = vrcp.f32 %v560_v34 }
 0x311   :  { %1399 = vrcp.f32 %v567_v41 }
 0x319   :  { %v1396_v37 = vpop.eup %1395 }
 0x31a   :  { %v1398_v39 = vpop.eup %1397  ;;  %v571_v40 = vmul.f32 %v1396_v37, %v1394_v36 }
 0x31b   :  { %v570_v42 = vmul.f32 %v1398_v39, %v1837_v38  ;;  %v1400_v43 = vpop.eup %1399  ;;  %v1265_v38 = vld [vmem:[%s2189_s0 + $0x60] sm:$0xff] }
 0x31d   :  { %v1890_v33 = vadd.f32 %v571_v40, %v570_v42 }
 0x31f   :  { %1401 = vtanh.f32 %v1890_v33 }
 0x329   :  { %v1402_v44 = vpop.eup %1401 }
 0x32a   :  { %v574_v45 = vmul.f32 %v1402_v44, %v1400_v43 }
 0x32c   :  { %v575_v46 = vpack.c.bf16 %v574_v45, %v574_v45 }
 0x32e   :  { %1264 = vst [vmem:[%s2190_s2 + $0x8] sm:$0xf] %v575_v46  ;;  %621 = vmatmul.mubr.bf16.vlgmr.msra.gmra.mrb[12].mxu0 %v575_v46  ;;  %662 = vmatmul.mubr.bf16.vlgmr.msra.gmra.mrb[12].mxu1 %v575_v46 }
 0x32f   :  { %712 = vmatpush1.bf16.msra.mxu0 %v1552_v2  ;;  %753 = vmatpush1.bf16.msra.mxu1 %v1580_v7 }
 0x330   :  { %713 = vmatprep.subr.bf16.mxu0 %v1558_v3  ;;  %754 = vmatprep.subr.bf16.mxu1 %v1599_v10 }
 0x331   :  { %743 = vmatprep.mubr.bf16.mxu0 %v1515_v1  ;;  %784 = vmatprep.mubr.bf16.mxu1 %v1515_v1 }
 0x333   :  { %714 = vmatpush1.bf16.msra.mxu0 %v1564_v4  ;;  %755 = vmatpush1.bf16.msra.mxu1 %v1604_v11 }
 0x334   :  { %715 = vmatprep.subr.bf16.mxu0 %v1570_v5  ;;  %756 = vmatprep.subr.bf16.mxu1 %v1621_v14 }
 0x337   :  { %716 = vmatpush1.bf16.msra.mxu0 %v1586_v8  ;;  %757 = vmatpush1.bf16.msra.mxu1 %v1628_v15 }
 0x338   :  { %717 = vmatprep.subr.bf16.mxu0 %v1593_v9  ;;  %758 = vmatprep.subr.bf16.mxu1 %v1634_v16 }
 0x33b   :  { %718 = vmatpush1.bf16.msra.mxu0 %v1611_v12  ;;  %759 = vmatpush1.bf16.msra.mxu1 %v1652_v19 }
 0x33c   :  { %719 = vmatprep.subr.bf16.mxu0 %v1616_v13  ;;  %760 = vmatprep.subr.bf16.mxu1 %v1658_v20 }
 0x33f   :  { %720 = vmatpush1.bf16.msra.mxu0 %v1640_v17  ;;  %761 = vmatpush1.bf16.msra.mxu1 %v1676_v23 }
 0x340   :  { %721 = vmatprep.subr.bf16.mxu0 %v1646_v18  ;;  %762 = vmatprep.subr.bf16.mxu1 %v1682_v24 }
 0x343   :  { %722 = vmatpush1.bf16.msra.mxu0 %v1664_v21  ;;  %763 = vmatpush1.bf16.msra.mxu1 %v1700_v27 }
 0x344   :  { %723 = vmatprep.subr.bf16.mxu0 %v1669_v22  ;;  %764 = vmatprep.subr.bf16.mxu1 %v1706_v28 }
 0x347   :  { %724 = vmatpush1.bf16.msra.mxu0 %v1688_v25  ;;  %765 = vmatpush1.bf16.msra.mxu1 %v1719_v30 }
 0x348   :  { %725 = vmatprep.subr.bf16.mxu0 %v1694_v26  ;;  %766 = vmatprep.subr.bf16.mxu1 %v1725_v31 }
 0x34b   :  { %726 = vmatpush1.bf16.msra.mxu0 %v1712_v29  ;;  %767 = vmatpush1.bf16.msra.mxu1 %v1732_v32 }
 0x34c   :  { %834 = vmatprep.subr.bf16.mxu0 %v1545_v0  ;;  %875 = vmatprep.subr.bf16.mxu1 %v1575_v6 }
 0x401   :  { %v622_v48 = vpop.f32.mrb[12].mxu0  ;;  %v663_v49 = vpop.f32.mrb[12].mxu1 }
 0x402   :  { %v670_v50 = vadd.f32 %v1265_v38, %v622_v48  ;;  %v624_v51 = vpop.f32.mrb[13].mxu0  ;;  %v665_v52 = vpop.f32.mrb[13].mxu1  ;;  %v672_v34 = vadd.f32 %v1267_v62, %v663_v49  ;;  %v1276_v62 = vld [vmem:[%s2189_s0 + $0x98] sm:$0xff] }
 0x403   :  { %v671_v53 = vadd.f32 %v1266_v47, %v624_v51  ;;  %v626_v54 = vpop.f32.mrb[14].mxu0  ;;  %v667_v55 = vpop.f32.mrb[14].mxu1  ;;  %v673_v61 = vadd.f32 %v1268_v60, %v665_v52  ;;  %v1274_v51 = vld [vmem:[%s2189_s0 + $0x88] sm:$0xff] }
 0x404   :  { %v1269_v56 = vmul.f32 -1.442695, %v670_v50  ;;  %v627_v57 = vpop.f32.mrb[15].mxu0  ;;  %v668_v58 = vpop.f32.mrb[15].mxu1 }
 0x405   :  { %v1270_v59 = vmul.f32 -1.442695, %v671_v53  ;;  %v1271_v63 = vmul.f32 -1.442695, %v673_v61 }
 0x406   :  { %1403 = vpow2.f32 %v1269_v56 }
 0x407   :  { %1405 = vpow2.f32 %v1270_v59 }
 0x408   :  { %1407 = vpow2.f32 %v1271_v63 }
 0x409   :  { %1409 = vtanh.f32 %v672_v34  ;;  %v1275_v34 = vld [vmem:[%s2189_s0 + $0x90] sm:$0xff] }
 0x410   :  { %v1404_v35 = vpop.eup %1403 }
 0x411   :  { %v1406_v36 = vpop.eup %1405  ;;  %v677_v37 = vadd.f32 1.0, %v1404_v35 }
 0x412   :  { %v683_v39 = vadd.f32 1.0, %v1406_v36  ;;  %v1408_v40 = vpop.eup %1407 }
 0x413   :  { %1411 = vrcp.f32 %v677_v37  ;;  %v1410_v41 = vpop.eup %1409  ;;  %v690_v45 = vadd.f32 1.0, %v1408_v40 }
 0x414   :  { %1413 = vrcp.f32 %v683_v39 }
 0x415   :  { %1415 = vrcp.f32 %v690_v45 }
 0x41d   :  { %v1412_v42 = vpop.eup %1411 }
 0x41e   :  { %v1414_v43 = vpop.eup %1413  ;;  %v694_v44 = vmul.f32 %v1412_v42, %v1410_v41 }
 0x41f   :  { %v693_v46 = vmul.f32 %v1414_v43, %v1890_v33  ;;  %v1416_v47 = vpop.eup %1415  ;;  %v1273_v33 = vld [vmem:[%s2189_s0 + $0x80] sm:$0xff] }
 0x421   :  { %v1943_v38 = vadd.f32 %v694_v44, %v693_v46 }
 0x423   :  { %1417 = vtanh.f32 %v1943_v38 }
 0x42d   :  { %v1418_v48 = vpop.eup %1417 }
 0x42e   :  { %v697_v49 = vmul.f32 %v1418_v48, %v1416_v47 }
 0x430   :  { %v698_v50 = vpack.c.bf16 %v697_v49, %v697_v49 }
 0x432   :  { %1272 = vst [vmem:[%s2190_s2 + $0xc] sm:$0xf] %v698_v50  ;;  %744 = vmatmul.mubr.bf16.vlgmr.msra.gmra.mrb[16].mxu0 %v698_v50  ;;  %785 = vmatmul.mubr.bf16.vlgmr.msra.gmra.mrb[16].mxu1 %v698_v50 }
 0x433   :  { %835 = vmatpush1.bf16.msra.mxu0 %v1552_v2  ;;  %876 = vmatpush1.bf16.msra.mxu1 %v1580_v7 }
 0x434   :  { %836 = vmatprep.subr.bf16.mxu0 %v1558_v3  ;;  %877 = vmatprep.subr.bf16.mxu1 %v1599_v10 }
 0x435   :  { %866 = vmatprep.mubr.bf16.mxu0 %v1515_v1  ;;  %907 = vmatprep.mubr.bf16.mxu1 %v1515_v1 }
 0x437   :  { %837 = vmatpush1.bf16.msra.mxu0 %v1564_v4  ;;  %878 = vmatpush1.bf16.msra.mxu1 %v1604_v11 }
 0x438   :  { %838 = vmatprep.subr.bf16.mxu0 %v1570_v5  ;;  %879 = vmatprep.subr.bf16.mxu1 %v1621_v14 }
 0x43b   :  { %839 = vmatpush1.bf16.msra.mxu0 %v1586_v8  ;;  %880 = vmatpush1.bf16.msra.mxu1 %v1628_v15 }
 0x43c   :  { %840 = vmatprep.subr.bf16.mxu0 %v1593_v9  ;;  %881 = vmatprep.subr.bf16.mxu1 %v1634_v16 }
 0x43f   :  { %841 = vmatpush1.bf16.msra.mxu0 %v1611_v12  ;;  %882 = vmatpush1.bf16.msra.mxu1 %v1652_v19 }
 0x440   :  { %842 = vmatprep.subr.bf16.mxu0 %v1616_v13  ;;  %883 = vmatprep.subr.bf16.mxu1 %v1658_v20 }
 0x443   :  { %843 = vmatpush1.bf16.msra.mxu0 %v1640_v17  ;;  %884 = vmatpush1.bf16.msra.mxu1 %v1676_v23 }
 0x444   :  { %844 = vmatprep.subr.bf16.mxu0 %v1646_v18  ;;  %885 = vmatprep.subr.bf16.mxu1 %v1682_v24 }
 0x447   :  { %845 = vmatpush1.bf16.msra.mxu0 %v1664_v21  ;;  %886 = vmatpush1.bf16.msra.mxu1 %v1700_v27 }
 0x448   :  { %846 = vmatprep.subr.bf16.mxu0 %v1669_v22  ;;  %887 = vmatprep.subr.bf16.mxu1 %v1706_v28 }
 0x44b   :  { %847 = vmatpush1.bf16.msra.mxu0 %v1688_v25  ;;  %888 = vmatpush1.bf16.msra.mxu1 %v1719_v30 }
 0x44c   :  { %848 = vmatprep.subr.bf16.mxu0 %v1694_v26  ;;  %889 = vmatprep.subr.bf16.mxu1 %v1725_v31 }
 0x44f   :  { %849 = vmatpush1.bf16.msra.mxu0 %v1712_v29  ;;  %890 = vmatpush1.bf16.msra.mxu1 %v1732_v32 }
 0x450   :  { %957 = vmatprep.subr.bf16.mxu0 %v1545_v0  ;;  %998 = vmatprep.subr.bf16.mxu1 %v1575_v6 }
 0x505   :  { %v745_v52 = vpop.f32.mrb[16].mxu0  ;;  %v786_v53 = vpop.f32.mrb[16].mxu1 }
 0x506   :  { %v793_v54 = vadd.f32 %v1273_v33, %v745_v52  ;;  %v747_v55 = vpop.f32.mrb[17].mxu0  ;;  %v788_v56 = vpop.f32.mrb[17].mxu1  ;;  %v795_v36 = vadd.f32 %v1275_v34, %v786_v53  ;;  %v1492_v34 = vld [vmem:[%s2188_s1 + $0x4c] ss:$16 sps:$4 sm:$0xff]  }
 0x507   :  { %v794_v57 = vadd.f32 %v1274_v51, %v747_v55  ;;  %v749_v58 = vpop.f32.mrb[18].mxu0  ;;  %v790_v59 = vpop.f32.mrb[18].mxu1  ;;  %v796_v63 = vadd.f32 %v1276_v62, %v788_v56  ;;  %v1490_v62 = vld [vmem:[%s2188_s1 + $0x28] ss:$16 sps:$4 sm:$0xff]  }
 0x508   :  { %v1277_v60 = vmul.f32 -1.442695, %v793_v54  ;;  %v750_v0 = vpop.f32.mrb[19].mxu0  ;;  %v791_v61 = vpop.f32.mrb[19].mxu1  ;;  %v1485_v59 = vld [vmem:[%s2188_s1] ss:$16 sps:$4 sm:$0xff]  }
 0x509   :  { %v1278_v6 = vmul.f32 -1.442695, %v794_v57  ;;  %v1279_v35 = vmul.f32 -1.442695, %v796_v63  ;;  %v1487_v0 = vld [vmem:[%s2188_s1 + $0x24] ss:$16 sps:$4 sm:$0xff]  }
 0x50a   :  { %1419 = vpow2.f32 %v1277_v60  ;;  %v1486_v60 = vld [vmem:[%s2188_s1 + $0x8] ss:$16 sps:$4 sm:$0xff]   ;;  %v1488_v61 = vld [vmem:[%s2188_s1 + $0x2c] ss:$16 sps:$4 sm:$0xff]   ;;  %v1491_v63 = vld [vmem:[%s2188_s1 + $0x44] ss:$16 sps:$4 sm:$0xff]  }
 0x50b   :  { %1421 = vpow2.f32 %v1278_v6  ;;  %v1489_v6 = vld [vmem:[%s2188_s1 + $0x20] ss:$16 sps:$4 sm:$0xff]  }
 0x50c   :  { %1423 = vpow2.f32 %v1279_v35  ;;  %v1494_v35 = vld [vmem:[%s2188_s1 + $0x48] ss:$16 sps:$4 sm:$0xff]  }
 0x50d   :  { %1425 = vtanh.f32 %v795_v36  ;;  %v1495_v36 = vld [vmem:[%s2188_s1 + $0x64] ss:$16 sps:$4 sm:$0xff]  }
 0x514   :  { %v1420_v37 = vpop.eup %1419 }
 0x515   :  { %v1422_v39 = vpop.eup %1421  ;;  %v800_v40 = vadd.f32 1.0, %v1420_v37  ;;  %v1496_v37 = vld [vmem:[%s2188_s1 + $0x6c] ss:$16 sps:$4 sm:$0xff]  }
 0x516   :  { %v806_v41 = vadd.f32 1.0, %v1422_v39  ;;  %v1424_v42 = vpop.eup %1423  ;;  %v1497_v39 = vld [vmem:[%s2188_s1 + $0x60] ss:$16 sps:$4 sm:$0xff]  }
 0x517   :  { %1427 = vrcp.f32 %v800_v40  ;;  %v1426_v43 = vpop.eup %1425  ;;  %v813_v47 = vadd.f32 1.0, %v1424_v42  ;;  %v1498_v40 = vld [vmem:[%s2188_s1 + $0x68] ss:$16 sps:$4 sm:$0xff]   ;;  %v1500_v42 = vld [vmem:[%s2188_s1 + $0x8c] ss:$16 sps:$4 sm:$0xff]  }
 0x518   :  { %1429 = vrcp.f32 %v806_v41  ;;  %v1499_v41 = vld [vmem:[%s2188_s1 + $0x84] ss:$16 sps:$4 sm:$0xff]  }
 0x519   :  { %1431 = vrcp.f32 %v813_v47  ;;  %v1505_v47 = vld [vmem:[%s2188_s1 + $0xa0] ss:$16 sps:$4 sm:$0xff]  }
 0x521   :  { %v1428_v44 = vpop.eup %1427 }
 0x522   :  { %v1430_v45 = vpop.eup %1429  ;;  %v817_v46 = vmul.f32 %v1428_v44, %v1426_v43  ;;  %v1501_v43 = vld [vmem:[%s2188_s1 + $0x80] ss:$16 sps:$4 sm:$0xff]   ;;  %v1502_v44 = vld [vmem:[%s2188_s1 + $0x88] ss:$16 sps:$4 sm:$0xff]  }
 0x523   :  { %v816_v48 = vmul.f32 %v1430_v45, %v1943_v38  ;;  %v1432_v50 = vpop.eup %1431  ;;  %v1503_v45 = vld [vmem:[%s2188_s1 + $0xa4] ss:$16 sps:$4 sm:$0xff]  }
 0x525   :  { %v1996_v49 = vadd.f32 %v817_v46, %v816_v48  ;;  %v1504_v46 = vld [vmem:[%s2188_s1 + $0xac] ss:$16 sps:$4 sm:$0xff]   ;;  %v1506_v48 = vld [vmem:[%s2188_s1 + $0xa8] ss:$16 sps:$4 sm:$0xff]  }
 0x527   :  { %1433 = vtanh.f32 %v1996_v49 }
 0x531   :  { %v1434_v33 = vpop.eup %1433 }
 0x532   :  { %v820_v51 = vmul.f32 %v1434_v33, %v1432_v50  ;;  %v1508_v50 = vld [vmem:[%s2188_s1 + $0xcc] ss:$16 sps:$4 sm:$0xff]   ;;  %v1509_v33 = vld [vmem:[%s2188_s1 + $0xc0] ss:$16 sps:$4 sm:$0xff]  }
 0x534   :  { %v821_v52 = vpack.c.bf16 %v820_v51, %v820_v51  ;;  %v1510_v51 = vld [vmem:[%s2188_s1 + $0xc8] ss:$16 sps:$4 sm:$0xff]  }
 0x536   :  { %1280 = vst [vmem:[%s2190_s2 + $0x10] sm:$0xf] %v821_v52  ;;  %867 = vmatmul.mubr.bf16.vlgmr.msra.gmra.mrb[20].mxu0 %v821_v52  ;;  %908 = vmatmul.mubr.bf16.vlgmr.msra.gmra.mrb[20].mxu1 %v821_v52  ;;  %v1511_v52 = vld [vmem:[%s2188_s1 + $0xe4] ss:$16 sps:$4 sm:$0xff]  }
 0x537   :  { %958 = vmatpush1.bf16.msra.mxu0 %v1552_v2  ;;  %999 = vmatpush1.bf16.msra.mxu1 %v1580_v7  ;;  %v1483_v2 = vld [vmem:[%s2188_s1 + $0x4] ss:$16 sps:$4 sm:$0xff]  }
 0x538   :  { %959 = vmatprep.subr.bf16.mxu0 %v1558_v3  ;;  %1000 = vmatprep.subr.bf16.mxu1 %v1599_v10  ;;  %v1484_v3 = vld [vmem:[%s2188_s1 + $0xc] ss:$16 sps:$4 sm:$0xff]  }
 0x539   :  { %989 = vmatprep.mubr.bf16.mxu0 %v1515_v1  ;;  %1030 = vmatprep.mubr.bf16.mxu1 %v1515_v1 }
 0x53b   :  { %960 = vmatpush1.bf16.msra.mxu0 %v1564_v4  ;;  %1001 = vmatpush1.bf16.msra.mxu1 %v1604_v11  ;;  %v1281_v4 = vld [vmem:[%s2189_s0 + $0xa0] sm:$0xff] }
 0x53c   :  { %961 = vmatprep.subr.bf16.mxu0 %v1570_v5  ;;  %1002 = vmatprep.subr.bf16.mxu1 %v1621_v14  ;;  %v1282_v5 = vld [vmem:[%s2189_s0 + $0xa8] sm:$0xff] }
 0x53f   :  { %962 = vmatpush1.bf16.msra.mxu0 %v1586_v8  ;;  %1003 = vmatpush1.bf16.msra.mxu1 %v1628_v15 }
 0x540   :  { %963 = vmatprep.subr.bf16.mxu0 %v1593_v9  ;;  %1004 = vmatprep.subr.bf16.mxu1 %v1634_v16 }
 0x543   :  { %964 = vmatpush1.bf16.msra.mxu0 %v1611_v12  ;;  %1005 = vmatpush1.bf16.msra.mxu1 %v1652_v19  ;;  %v1284_v19 = vld [vmem:[%s2189_s0 + $0xb8] sm:$0xff] }
 0x544   :  { %965 = vmatprep.subr.bf16.mxu0 %v1616_v13  ;;  %1006 = vmatprep.subr.bf16.mxu1 %v1658_v20 }
 0x547   :  { %966 = vmatpush1.bf16.msra.mxu0 %v1640_v17  ;;  %1007 = vmatpush1.bf16.msra.mxu1 %v1676_v23 }
 0x548   :  { %967 = vmatprep.subr.bf16.mxu0 %v1646_v18  ;;  %1008 = vmatprep.subr.bf16.mxu1 %v1682_v24 }
 0x54b   :  { %968 = vmatpush1.bf16.msra.mxu0 %v1664_v21  ;;  %1009 = vmatpush1.bf16.msra.mxu1 %v1700_v27  ;;  %v1283_v21 = vld [vmem:[%s2189_s0 + $0xb0] sm:$0xff] }
 0x54c   :  { %969 = vmatprep.subr.bf16.mxu0 %v1669_v22  ;;  %1010 = vmatprep.subr.bf16.mxu1 %v1706_v28 }
 0x54f   :  { %970 = vmatpush1.bf16.msra.mxu0 %v1688_v25  ;;  %1011 = vmatpush1.bf16.msra.mxu1 %v1719_v30 }
 0x550   :  { %971 = vmatprep.subr.bf16.mxu0 %v1694_v26  ;;  %1012 = vmatprep.subr.bf16.mxu1 %v1725_v31 }
 0x553   :  { %972 = vmatpush1.bf16.msra.mxu0 %v1712_v29  ;;  %1013 = vmatpush1.bf16.msra.mxu1 %v1732_v32 }
 0x554   :  { %1080 = vmatprep.subr.bf16.mxu0 %v1483_v2  ;;  %1121 = vmatprep.subr.bf16.mxu1 %v1484_v3  ;;  %v1512_v2 = vld [vmem:[%s2188_s1 + $0xec] ss:$16 sps:$4 sm:$0xff]   ;;  %v1513_v3 = vld [vmem:[%s2188_s1 + $0xe0] ss:$16 sps:$4 sm:$0xff]  }
 0x609   :  { %v868_v7 = vpop.f32.mrb[20].mxu0  ;;  %v909_v8 = vpop.f32.mrb[20].mxu1 }
 0x60a   :  { %v916_v9 = vadd.f32 %v1281_v4, %v868_v7  ;;  %v870_v10 = vpop.f32.mrb[21].mxu0  ;;  %v911_v11 = vpop.f32.mrb[21].mxu1  ;;  %v918_v23 = vadd.f32 %v1283_v21, %v909_v8  ;;  %v1514_v4 = vld [vmem:[%s2188_s1 + $0xe8] ss:$16 sps:$4 sm:$0xff]  }
 0x60b   :  { %v917_v12 = vadd.f32 %v1282_v5, %v870_v10  ;;  %v872_v13 = vpop.f32.mrb[22].mxu0  ;;  %v913_v14 = vpop.f32.mrb[22].mxu1  ;;  %v919_v20 = vadd.f32 %v1284_v19, %v911_v11  ;;  %v1289_v5 = vld [vmem:[%s2189_s0 + $0xc0] sm:$0xff]  ;;  %v1290_v7 = vld [vmem:[%s2189_s0 + $0xc8] sm:$0xff] }
 0x60c   :  { %v1285_v15 = vmul.f32 -1.442695, %v916_v9  ;;  %v873_v16 = vpop.f32.mrb[23].mxu0  ;;  %v914_v17 = vpop.f32.mrb[23].mxu1 }
 0x60d   :  { %v1286_v18 = vmul.f32 -1.442695, %v917_v12  ;;  %v1287_v22 = vmul.f32 -1.442695, %v919_v20  ;;  %v1292_v20 = vld [vmem:[%s2189_s0 + $0xd8] sm:$0xff] }
 0x60e   :  { %1435 = vpow2.f32 %v1285_v15 }
 0x60f   :  { %1437 = vpow2.f32 %v1286_v18 }
 0x610   :  { %1439 = vpow2.f32 %v1287_v22  ;;  %v1291_v22 = vld [vmem:[%s2189_s0 + $0xd0] sm:$0xff] }
 0x611   :  { %1441 = vtanh.f32 %v918_v23 }
 0x618   :  { %v1436_v24 = vpop.eup %1435 }
 0x619   :  { %v1438_v25 = vpop.eup %1437  ;;  %v923_v26 = vadd.f32 1.0, %v1436_v24 }
 0x61a   :  { %v929_v27 = vadd.f32 1.0, %v1438_v25  ;;  %v1440_v28 = vpop.eup %1439 }
 0x61b   :  { %1443 = vrcp.f32 %v923_v26  ;;  %v1442_v29 = vpop.eup %1441  ;;  %v936_v38 = vadd.f32 1.0, %v1440_v28 }
 0x61c   :  { %1445 = vrcp.f32 %v929_v27 }
 0x61d   :  { %1447 = vrcp.f32 %v936_v38 }
 0x625   :  { %v1444_v30 = vpop.eup %1443 }
 0x626   :  { %v1446_v31 = vpop.eup %1445  ;;  %v940_v32 = vmul.f32 %v1444_v30, %v1442_v29 }
 0x627   :  { %v939_v53 = vmul.f32 %v1446_v31, %v1996_v49  ;;  %v1448_v55 = vpop.eup %1447  ;;  %v1507_v49 = vld [vmem:[%s2188_s1 + $0xc4] ss:$16 sps:$4 sm:$0xff]  }
 0x629   :  { %v2053_v54 = vadd.f32 %v940_v32, %v939_v53 }
 0x62b   :  { %1449 = vtanh.f32 %v2053_v54 }
 0x635   :  { %v1450_v56 = vpop.eup %1449 }
 0x636   :  { %v943_v57 = vmul.f32 %v1450_v56, %v1448_v55 }
 0x638   :  { %v944_v58 = vpack.c.bf16 %v943_v57, %v943_v57 }
 0x63a   :  { %1288 = vst [vmem:[%s2190_s2 + $0x14] sm:$0xf] %v944_v58  ;;  %990 = vmatmul.mubr.bf16.vlgmr.msra.gmra.mrb[24].mxu0 %v944_v58  ;;  %1031 = vmatmul.mubr.bf16.vlgmr.msra.gmra.mrb[24].mxu1 %v944_v58 }
 0x63b   :  { %1081 = vmatpush1.bf16.msra.mxu0 %v1485_v59  ;;  %1122 = vmatpush1.bf16.msra.mxu1 %v1486_v60 }
 0x63c   :  { %1082 = vmatprep.subr.bf16.mxu0 %v1487_v0  ;;  %1123 = vmatprep.subr.bf16.mxu1 %v1488_v61  ;;  %v1297_v0 = vld [vmem:[%s2189_s0 + $0xe0] sm:$0xff] }
 0x63d   :  { %1112 = vmatprep.mubr.bf16.mxu0 %v1515_v1  ;;  %1153 = vmatprep.mubr.bf16.mxu1 %v1515_v1  ;;  %v1493_v1 = vld [vmem:[%s2188_s1 + $0x40] ss:$16 sps:$4 sm:$0xff]  }
 0x63f   :  { %1083 = vmatpush1.bf16.msra.mxu0 %v1489_v6  ;;  %1124 = vmatpush1.bf16.msra.mxu1 %v1490_v62 }
 0x640   :  { %1084 = vmatprep.subr.bf16.mxu0 %v1491_v63  ;;  %1125 = vmatprep.subr.bf16.mxu1 %v1492_v34 }
 0x643   :  { %1085 = vmatpush1.bf16.msra.mxu0 %v1493_v1  ;;  %1126 = vmatpush1.bf16.msra.mxu1 %v1494_v35 }
 0x644   :  { %1086 = vmatprep.subr.bf16.mxu0 %v1495_v36  ;;  %1127 = vmatprep.subr.bf16.mxu1 %v1496_v37 }
 0x647   :  { %1087 = vmatpush1.bf16.msra.mxu0 %v1497_v39  ;;  %1128 = vmatpush1.bf16.msra.mxu1 %v1498_v40 }
 0x648   :  { %1088 = vmatprep.subr.bf16.mxu0 %v1499_v41  ;;  %1129 = vmatprep.subr.bf16.mxu1 %v1500_v42  ;;  %v1300_v42 = vld [vmem:[%s2189_s0 + $0xf8] sm:$0xff] }
 0x64b   :  { %1089 = vmatpush1.bf16.msra.mxu0 %v1501_v43  ;;  %1130 = vmatpush1.bf16.msra.mxu1 %v1502_v44  ;;  %v1299_v44 = vld [vmem:[%s2189_s0 + $0xf0] sm:$0xff] }
 0x64c   :  { %1090 = vmatprep.subr.bf16.mxu0 %v1503_v45  ;;  %1131 = vmatprep.subr.bf16.mxu1 %v1504_v46 }
 0x64f   :  { %1091 = vmatpush1.bf16.msra.mxu0 %v1505_v47  ;;  %1132 = vmatpush1.bf16.msra.mxu1 %v1506_v48 }
 0x650   :  { %1092 = vmatprep.subr.bf16.mxu0 %v1507_v49  ;;  %1133 = vmatprep.subr.bf16.mxu1 %v1508_v50 }
 0x653   :  { %1093 = vmatpush1.bf16.msra.mxu0 %v1509_v33  ;;  %1134 = vmatpush1.bf16.msra.mxu1 %v1510_v51 }
 0x654   :  { %1094 = vmatprep.subr.bf16.mxu0 %v1511_v52  ;;  %1135 = vmatprep.subr.bf16.mxu1 %v1512_v2 }
 0x657   :  { %1095 = vmatpush1.bf16.msra.mxu0 %v1513_v3  ;;  %1136 = vmatpush1.bf16.msra.mxu1 %v1514_v4 }
 0x70d   :  { %v991_v8 = vpop.f32.mrb[24].mxu0  ;;  %v1032_v9 = vpop.f32.mrb[24].mxu1 }
 0x70e   :  { %v1039_v10 = vadd.f32 %v1289_v5, %v991_v8  ;;  %v993_v11 = vpop.f32.mrb[25].mxu0  ;;  %v1034_v12 = vpop.f32.mrb[25].mxu1  ;;  %v1041_v24 = vadd.f32 %v1291_v22, %v1032_v9 }
 0x70f   :  { %v1040_v13 = vadd.f32 %v1290_v7, %v993_v11  ;;  %v995_v14 = vpop.f32.mrb[26].mxu0  ;;  %v1036_v15 = vpop.f32.mrb[26].mxu1  ;;  %v1042_v21 = vadd.f32 %v1292_v20, %v1034_v12 }
 0x710   :  { %v1293_v16 = vmul.f32 -1.442695, %v1039_v10  ;;  %v996_v17 = vpop.f32.mrb[27].mxu0  ;;  %v1037_v18 = vpop.f32.mrb[27].mxu1 }
 0x711   :  { %v1294_v19 = vmul.f32 -1.442695, %v1040_v13  ;;  %v1295_v23 = vmul.f32 -1.442695, %v1042_v21 }
 0x712   :  { %1451 = vpow2.f32 %v1293_v16 }
 0x713   :  { %1453 = vpow2.f32 %v1294_v19 }
 0x714   :  { %1455 = vpow2.f32 %v1295_v23 }
 0x715   :  { %1457 = vtanh.f32 %v1041_v24 }
 0x71c   :  { %v1452_v25 = vpop.eup %1451 }
 0x71d   :  { %v1454_v26 = vpop.eup %1453  ;;  %v1046_v27 = vadd.f32 1.0, %v1452_v25 }
 0x71e   :  { %v1052_v28 = vadd.f32 1.0, %v1454_v26  ;;  %v1456_v29 = vpop.eup %1455 }
 0x71f   :  { %1459 = vrcp.f32 %v1046_v27  ;;  %v1458_v30 = vpop.eup %1457  ;;  %v1059_v53 = vadd.f32 1.0, %v1456_v29 }
 0x720   :  { %1461 = vrcp.f32 %v1052_v28 }
 0x721   :  { %1463 = vrcp.f32 %v1059_v53 }
 0x729   :  { %v1460_v31 = vpop.eup %1459 }
 0x72a   :  { %v1462_v32 = vpop.eup %1461  ;;  %v1063_v38 = vmul.f32 %v1460_v31, %v1458_v30 }
 0x72b   :  { %v1062_v55 = vmul.f32 %v1462_v32, %v2053_v54  ;;  %v1464_v57 = vpop.eup %1463  ;;  %v1298_v54 = vld [vmem:[%s2189_s0 + $0xe8] sm:$0xff] }
 0x72d   :  { %v1064_v56 = vadd.f32 %v1063_v38, %v1062_v55 }
 0x72f   :  { %1465 = vtanh.f32 %v1064_v56 }
 0x739   :  { %v1466_v58 = vpop.eup %1465 }
 0x73a   :  { %v1066_v59 = vmul.f32 %v1466_v58, %v1464_v57 }
 0x73c   :  { %v1067_v60 = vpack.c.bf16 %v1066_v59, %v1066_v59 }
 0x73e   :  { %1296 = vst [vmem:[%s2190_s2 + $0x18] sm:$0xf] %v1067_v60  ;;  %1113 = vmatmul.mubr.bf16.vlgmr.msra.gmra.mrb[28].mxu0 %v1067_v60  ;;  %1154 = vmatmul.mubr.bf16.vlgmr.msra.gmra.mrb[28].mxu1 %v1067_v60 }
 0x811   :  { %v1114_v61 = vpop.f32.mrb[28].mxu0  ;;  %v1155_v6 = vpop.f32.mrb[28].mxu1 }
 0x812   :  { %v1162_v62 = vadd.f32 %v1297_v0, %v1114_v61  ;;  %v1116_v63 = vpop.f32.mrb[29].mxu0  ;;  %v1157_v34 = vpop.f32.mrb[29].mxu1  ;;  %v1164_v46 = vadd.f32 %v1299_v44, %v1155_v6 }
 0x813   :  { %v1163_v1 = vadd.f32 %v1298_v54, %v1116_v63  ;;  %v1118_v35 = vpop.f32.mrb[30].mxu0  ;;  %v1159_v36 = vpop.f32.mrb[30].mxu1  ;;  %v1165_v43 = vadd.f32 %v1300_v42, %v1157_v34 }
 0x814   :  { %v1301_v37 = vmul.f32 -1.442695, %v1162_v62  ;;  %v1119_v39 = vpop.f32.mrb[31].mxu0  ;;  %v1160_v40 = vpop.f32.mrb[31].mxu1 }
 0x815   :  { %v1302_v41 = vmul.f32 -1.442695, %v1163_v1  ;;  %v1303_v45 = vmul.f32 -1.442695, %v1165_v43 }
 0x816   :  { %1467 = vpow2.f32 %v1301_v37 }
 0x817   :  { %1469 = vpow2.f32 %v1302_v41 }
 0x818   :  { %1471 = vpow2.f32 %v1303_v45 }
 0x819   :  { %1473 = vtanh.f32 %v1164_v46 }
 0x820   :  { %v1468_v47 = vpop.eup %1467 }
 0x821   :  { %v1470_v48 = vpop.eup %1469  ;;  %v1169_v49 = vadd.f32 1.0, %v1468_v47 }
 0x822   :  { %v1175_v50 = vadd.f32 1.0, %v1470_v48  ;;  %v1472_v33 = vpop.eup %1471 }
 0x823   :  { %1475 = vrcp.f32 %v1169_v49  ;;  %v1474_v51 = vpop.eup %1473  ;;  %v1182_v4 = vadd.f32 1.0, %v1472_v33 }
 0x824   :  { %1477 = vrcp.f32 %v1175_v50 }
 0x825   :  { %1479 = vrcp.f32 %v1182_v4 }
 0x82d   :  { %v1476_v52 = vpop.eup %1475 }
 0x82e   :  { %v1478_v2 = vpop.eup %1477  ;;  %v1186_v3 = vmul.f32 %v1476_v52, %v1474_v51 }
 0x82f   :  { %v1185_v5 = vmul.f32 %v1478_v2, %v1064_v56  ;;  %v1480_v8 = vpop.eup %1479 }
 0x831   :  { %v1187_v7 = vadd.f32 %v1186_v3, %v1185_v5 }
 0x833   :  { %1481 = vtanh.f32 %v1187_v7  ;;  %1201 = vst [vmem:[%s2191_s4] sm:$0xff] %v1187_v7 }
 0x83d   :  { %v1482_v9 = vpop.eup %1481 }
 0x83e   :  { %v1189_v10 = vmul.f32 %v1482_v9, %v1480_v8 }
 0x840   :  { %v1190_v11 = vpack.c.bf16 %v1189_v10, %v1189_v10  ;;  %1199 = vst [vmem:[%s2192_s3] sm:$0xff] %v1189_v10 }
 0x842   :  { %1304 = vst [vmem:[%s2190_s2 + $0x1c] sm:$0xf] %v1190_v11 }

</bundles_post_ra>
